<compile_context>
chip_gen: v5e
topology: v5e:2x2
jax: 0.10.0
libtpu: 0.0.40
codegen_flags: <defaults>
</compile_context>

<pallas_src>
import math

import jax
import jax.numpy as jnp
from jax.experimental import pallas as pl
from jax.experimental.pallas import tpu as pltpu


# ---------------------------------------------------------------------------
# Kernel
# ---------------------------------------------------------------------------
def _hypernet_kernel(z_ref, w1_ref, b1_ref, w2_ref, b2_ref, wo_ref, bo_ref,
                     o_ref, h_ref):
    # Trunk MLP computed once per row tile (j == 0), cached as bf16 in VMEM.
    @pl.when(pl.program_id(1) == 0)
    def _():
        h = jnp.dot(z_ref[...], w1_ref[...], preferred_element_type=jnp.float32)
        h = jnp.maximum(h + b1_ref[...], 0.0)
        h = jnp.dot(h.astype(jnp.bfloat16), w2_ref[...],
                    preferred_element_type=jnp.float32)
        h = jnp.maximum(h + b2_ref[...], 0.0)
        h_ref[...] = h.astype(jnp.bfloat16)

    # One column tile of the packed (concatenated) head matmul per j step.
    out = jnp.dot(h_ref[...], wo_ref[...], preferred_element_type=jnp.float32)
    o_ref[...] = (out + bo_ref[...]).astype(o_ref.dtype)


# ---------------------------------------------------------------------------
# Wrapper helpers
# ---------------------------------------------------------------------------
def _round_up(x, m):
    return ((x + m - 1) // m) * m


def head_layout(xdim, wdim, ydim, num_layers):
    """(name, size) list, same order as the PyTorch ModuleDict insertion."""
    heads = [
        ("w_in", xdim * wdim),
        ("b_in", wdim),
        ("w_out", ydim * wdim),
        ("b_out", ydim),
    ]
    for i in range(1, num_layers):
        heads.append(("w_%d" % i, wdim * wdim))
        heads.append(("b_%d" % i, wdim))
    return heads


def pack_heads(head_params, heads):
    """Concatenate per-head (W_t, b) into one (512, D_pad) weight / (D_pad,) bias,
    zero-padded so D_pad is a multiple of 256 (full MXU tiles, lane-dense stores)."""
    w_cols = [head_params[name][0] for name, _ in heads]   # each (512, d_k)
    b_cols = [head_params[name][1] for name, _ in heads]   # each (d_k,)
    w_cat = jnp.concatenate(w_cols, axis=1)
    b_cat = jnp.concatenate(b_cols, axis=0)
    d_out = w_cat.shape[1]
    d_pad = _round_up(d_out, 256)
    if d_pad != d_out:
        w_cat = jnp.pad(w_cat, ((0, 0), (0, d_pad - d_out)))
        b_cat = jnp.pad(b_cat, (0, d_pad - d_out))
    return w_cat, b_cat, d_out


def split_heads(packed_out, heads):
    """Slice the concatenated (B, D_pad) output back into the per-head dict."""
    result = {}
    off = 0
    for name, size in heads:
        result[name] = packed_out[:, off:off + size]
        off += size
    return result


# ---------------------------------------------------------------------------
# Forward
# ---------------------------------------------------------------------------
def hypernetwork_forward(z, w1_t, b1, w2_t, b2, wo_t, bo, *, tm=512,
                         out_dtype=None):
    """z: (B, zdim). Weights stored pre-transposed: w1_t (zdim,256),
    w2_t (256,512), wo_t (512, D_pad), bo (D_pad,).
    Returns the concatenated head output (B, D_pad) in `out_dtype` (default z.dtype)."""
    B, zdim = z.shape
    h1 = w1_t.shape[1]
    h2 = w2_t.shape[1]
    d_pad = wo_t.shape[1]
    out_dtype = z.dtype if out_dtype is None else out_dtype

    # Balanced row tiling: multiple of 16 (bf16 sublane packing), no 2x cliff.
    n_row_tiles = max(1, pl.cdiv(B, tm))
    tile_m = _round_up(pl.cdiv(B, n_row_tiles), 16)
    m_pad = _round_up(B, tile_m)

    # Packed-head column tile: multiple of the 256-wide MXU that divides d_pad
    # (d_pad is always a multiple of 256 from pack_heads).
    tn = 512 if d_pad % 512 == 0 else 256

    zb = z.astype(jnp.bfloat16)
    if m_pad != B:
        zb = jnp.pad(zb, ((0, m_pad - B), (0, 0)))

    grid = (m_pad // tile_m, d_pad // tn)

    flops = 2 * m_pad * (zdim * h1 + h1 * h2 + h2 * d_pad)
    bytes_accessed = (
        m_pad * zdim * 2                                     # z (bf16)
        + (zdim * h1 + h1 * h2 + h2 * d_pad) * 2             # weights (bf16)
        + (h1 + h2 + d_pad) * 4                              # biases (f32)
        + m_pad * d_pad * jnp.dtype(out_dtype).itemsize      # output
    )

    const = dict(pipeline_mode=pl.Buffered(1))   # never re-fetched -> 1 buffer

    out = pl.pallas_call(
        _hypernet_kernel,
        out_shape=jax.ShapeDtypeStruct((m_pad, d_pad), out_dtype),
        grid=grid,
        in_specs=[
            pl.BlockSpec((tile_m, zdim), lambda i, j: (i, 0)),          # z tile
            pl.BlockSpec((zdim, h1), lambda i, j: (0, 0), **const),     # W1^T
            pl.BlockSpec((1, h1), lambda i, j: (0, 0), **const),        # b1
            pl.BlockSpec((h1, h2), lambda i, j: (0, 0), **const),       # W2^T
            pl.BlockSpec((1, h2), lambda i, j: (0, 0), **const),        # b2
            pl.BlockSpec((h2, tn), lambda i, j: (0, j)),                # wo tile
            pl.BlockSpec((1, tn), lambda i, j: (0, j)),                 # bo tile
        ],
        out_specs=pl.BlockSpec((tile_m, tn), lambda i, j: (i, j)),
        scratch_shapes=[pltpu.VMEM((tile_m, h2), jnp.bfloat16)],        # cached h
        compiler_params=pltpu.CompilerParams(
            dimension_semantics=("parallel", "arbitrary"),
        ),
        cost_estimate=pl.CostEstimate(
            flops=int(flops), transcendentals=0,
            bytes_accessed=int(bytes_accessed)),
    )(
        zb,
        w1_t.astype(jnp.bfloat16), b1.reshape(1, h1).astype(jnp.float32),
        w2_t.astype(jnp.bfloat16), b2.reshape(1, h2).astype(jnp.float32),
        wo_t.astype(jnp.bfloat16), bo.reshape(1, d_pad).astype(jnp.float32),
    )
    return out[:B]


# ---------------------------------------------------------------------------
# References
# ---------------------------------------------------------------------------
def _reference_f32(z, w1_t, b1, w2_t, b2, head_params, heads):
    """Pure f32 reference mirroring the PyTorch forward exactly."""
    h = jnp.maximum(z @ w1_t + b1, 0.0)
    h = jnp.maximum(h @ w2_t + b2, 0.0)
    return {name: h @ head_params[name][0] + head_params[name][1]
            for name, _ in heads}


def _reference_bf16(z, w1_t, b1, w2_t, b2, head_params, heads):
    """Precision-matched reference (bf16 MXU inputs, f32 accumulation)."""
    h = jnp.dot(z.astype(jnp.bfloat16), w1_t.astype(jnp.bfloat16),
                preferred_element_type=jnp.float32)
    h = jnp.maximum(h + b1, 0.0)
    h = jnp.dot(h.astype(jnp.bfloat16), w2_t.astype(jnp.bfloat16),
                preferred_element_type=jnp.float32)
    h = jnp.maximum(h + b2, 0.0)
    hb = h.astype(jnp.bfloat16)
    out = {}
    for name, _ in heads:
        w, b = head_params[name]
        out[name] = jnp.dot(hb, w.astype(jnp.bfloat16),
                            preferred_element_type=jnp.float32) + b
    return out


# ---------------------------------------------------------------------------
# Test
# ---------------------------------------------------------------------------
def _linear_init(key, fan_in, fan_out, dtype=jnp.float32):
    """PyTorch-style nn.Linear init; weight stored transposed as (fan_in, fan_out)."""
    kw, kb = jax.random.split(key)
    bound = 1.0 / math.sqrt(fan_in)
    w_t = jax.random.uniform(kw, (fan_in, fan_out), dtype, -bound, bound)
    b = jax.random.uniform(kb, (fan_out,), dtype, -bound, bound)
    return w_t, b


if __name__ == "__main__":
    # Small shapes consistent with the module: z is (B, zdim).
    B, zdim, xdim, wdim, ydim, num_layers = 8, 32, 4, 32, 2, 3

    heads = head_layout(xdim, wdim, ydim, num_layers)

    key = jax.random.PRNGKey(0)
    kz, k1, k2, kh = jax.random.split(key, 4)

    z = jax.random.normal(kz, (B, zdim), dtype=jnp.float32)

    w1_t, b1 = _linear_init(k1, zdim, 256)
    w2_t, b2 = _linear_init(k2, 256, 512)

    head_keys = jax.random.split(kh, len(heads))
    head_params = {
        name: _linear_init(head_keys[i], 512, size)
        for i, (name, size) in enumerate(heads)
    }

    # Pack all head Linears into one lane-dense matmul (padded to 256 cols).
    wo_t, bo, d_out = pack_heads(head_params, heads)

    packed = hypernetwork_forward(z, w1_t, b1, w2_t, b2, wo_t, bo)
    packed = jax.block_until_ready(packed)
    out = split_heads(packed, heads)

    ref_bf16 = _reference_bf16(z, w1_t, b1, w2_t, b2, head_params, heads)
    ref_f32 = _reference_f32(z, w1_t, b1, w2_t, b2, head_params, heads)

    assert set(out.keys()) == set(k for k, _ in heads)
    for name, size in heads:
        assert out[name].shape == (B, size), (name, out[name].shape)
        # Exact-precision check against the matched bf16/f32-acc reference.
        assert jnp.allclose(out[name], ref_bf16[name], atol=1e-4, rtol=1e-4), \
            f"mismatch vs precision-matched reference in head {name}"
        # Loose semantic check against the pure f32 PyTorch-equivalent reference.
        assert jnp.allclose(out[name], ref_f32[name], atol=5e-2, rtol=5e-2), \
            f"mismatch vs f32 reference in head {name}"

    print("KERNEL_OK")
</pallas_src>

<mosaic_0001>
module attributes {stable_mosaic.version = 11 : i64} {
  func.func @_hypernet_kernel(%arg0: i32, %arg1: i32, %arg2: memref<16x32xbf16, #tpu.memory_space<vmem>>, %arg3: memref<32x256xbf16, #tpu.memory_space<vmem>>, %arg4: memref<1x256xf32, #tpu.memory_space<vmem>>, %arg5: memref<256x512xbf16, #tpu.memory_space<vmem>>, %arg6: memref<1x512xf32, #tpu.memory_space<vmem>>, %arg7: memref<512x512xbf16, #tpu.memory_space<vmem>>, %arg8: memref<1x512xf32, #tpu.memory_space<vmem>>, %arg9: memref<16x512xf32, #tpu.memory_space<vmem>>, %arg10: memref<16x512xbf16, #tpu.memory_space<vmem>>) attributes {dimension_semantics = [#tpu.dimension_semantics<parallel>, #tpu.dimension_semantics<arbitrary>], iteration_bounds = array<i64: 1, 5>, scalar_prefetch = 0 : i64, scratch_operands = 1 : i64, tpu.core_type = #tpu.core_type<tc>, window_params = [{transform_indices = @transform_0, window_bounds = array<i64: 16, 32>}, {pipeline_mode = #tpu.pipeline_mode<synchronous>, transform_indices = @transform_1, window_bounds = array<i64: 32, 256>}, {pipeline_mode = #tpu.pipeline_mode<synchronous>, transform_indices = @transform_2, window_bounds = array<i64: 1, 256>}, {pipeline_mode = #tpu.pipeline_mode<synchronous>, transform_indices = @transform_3, window_bounds = array<i64: 256, 512>}, {pipeline_mode = #tpu.pipeline_mode<synchronous>, transform_indices = @transform_4, window_bounds = array<i64: 1, 512>}, {transform_indices = @transform_5, window_bounds = array<i64: 512, 512>}, {transform_indices = @transform_6, window_bounds = array<i64: 1, 512>}, {transform_indices = @transform_7, window_bounds = array<i64: 16, 512>}]} {
    %c0_i32 = arith.constant 0 : i32
    %0 = arith.cmpi eq, %arg1, %c0_i32 : i32
    %1 = arith.extui %0 : i1 to i32
    %c0_i32_0 = arith.constant 0 : i32
    %2 = arith.cmpi ne, %1, %c0_i32_0 : i32
    scf.if %2 {
      %c0_8 = arith.constant 0 : index
      %c0_9 = arith.constant 0 : index
      %10 = vector.load %arg2[%c0_8, %c0_9] : memref<16x32xbf16, #tpu.memory_space<vmem>>, vector<16x32xbf16>
      %c0_10 = arith.constant 0 : index
      %c0_11 = arith.constant 0 : index
      %11 = vector.load %arg3[%c0_10, %c0_11] : memref<32x256xbf16, #tpu.memory_space<vmem>>, vector<32x256xbf16>
      %cst_12 = arith.constant dense<0.000000e+00> : vector<16x256xf32>
      %12 = tpu.matmul %10, %11, %cst_12 {dimension_numbers = #tpu.dot_dimension_numbers<[1], [0], [0], [1], [0, 0, 1, 1], [], []>} : vector<16x32xbf16>, vector<32x256xbf16>, vector<16x256xf32> -> vector<16x256xf32>
      %c0_13 = arith.constant 0 : index
      %c0_14 = arith.constant 0 : index
      %13 = vector.load %arg4[%c0_13, %c0_14] : memref<1x256xf32, #tpu.memory_space<vmem>>, vector<1x256xf32>
      %14 = vector.broadcast %13 : vector<1x256xf32> to vector<16x256xf32>
      %15 = arith.addf %12, %14 : vector<16x256xf32>
      %cst_15 = arith.constant 0.000000e+00 : f32
      %16 = vector.broadcast %cst_15 : f32 to vector<16x256xf32>
      %17 = arith.maximumf %15, %16 : vector<16x256xf32>
      %18 = arith.truncf %17 : vector<16x256xf32> to vector<16x256xbf16>
      %c0_16 = arith.constant 0 : index
      %c0_17 = arith.constant 0 : index
      %19 = vector.load %arg5[%c0_16, %c0_17] : memref<256x512xbf16, #tpu.memory_space<vmem>>, vector<256x512xbf16>
      %cst_18 = arith.constant dense<0.000000e+00> : vector<16x512xf32>
      %20 = tpu.matmul %18, %19, %cst_18 {dimension_numbers = #tpu.dot_dimension_numbers<[1], [0], [0], [1], [0, 0, 1, 1], [], []>} : vector<16x256xbf16>, vector<256x512xbf16>, vector<16x512xf32> -> vector<16x512xf32>
      %c0_19 = arith.constant 0 : index
      %c0_20 = arith.constant 0 : index
      %21 = vector.load %arg6[%c0_19, %c0_20] : memref<1x512xf32, #tpu.memory_space<vmem>>, vector<1x512xf32>
      %22 = vector.broadcast %21 : vector<1x512xf32> to vector<16x512xf32>
      %23 = arith.addf %20, %22 : vector<16x512xf32>
      %cst_21 = arith.constant 0.000000e+00 : f32
      %24 = vector.broadcast %cst_21 : f32 to vector<16x512xf32>
      %25 = arith.maximumf %23, %24 : vector<16x512xf32>
      %26 = arith.truncf %25 : vector<16x512xf32> to vector<16x512xbf16>
      %c0_22 = arith.constant 0 : index
      %c0_23 = arith.constant 0 : index
      %27 = vector.load %arg10[%c0_22, %c0_23] : memref<16x512xbf16, #tpu.memory_space<vmem>>, vector<16x512xbf16>
      tpu.vector_store %arg10[%c0_22, %c0_23], %26 {strides = array<i32>} : memref<16x512xbf16, #tpu.memory_space<vmem>>, vector<16x512xbf16>,
    } else {
    }
    %c0 = arith.constant 0 : index
    %c0_1 = arith.constant 0 : index
    %3 = vector.load %arg10[%c0, %c0_1] : memref<16x512xbf16, #tpu.memory_space<vmem>>, vector<16x512xbf16>
    %c0_2 = arith.constant 0 : index
    %c0_3 = arith.constant 0 : index
    %4 = vector.load %arg7[%c0_2, %c0_3] : memref<512x512xbf16, #tpu.memory_space<vmem>>, vector<512x512xbf16>
    %cst = arith.constant dense<0.000000e+00> : vector<16x512xf32>
    %5 = tpu.matmul %3, %4, %cst {dimension_numbers = #tpu.dot_dimension_numbers<[1], [0], [0], [1], [0, 0, 1, 1], [], []>} : vector<16x512xbf16>, vector<512x512xbf16>, vector<16x512xf32> -> vector<16x512xf32>
    %c0_4 = arith.constant 0 : index
    %c0_5 = arith.constant 0 : index
    %6 = vector.load %arg8[%c0_4, %c0_5] : memref<1x512xf32, #tpu.memory_space<vmem>>, vector<1x512xf32>
    %7 = vector.broadcast %6 : vector<1x512xf32> to vector<16x512xf32>
    %8 = arith.addf %5, %7 : vector<16x512xf32>
    %c0_6 = arith.constant 0 : index
    %c0_7 = arith.constant 0 : index
    %9 = vector.load %arg9[%c0_6, %c0_7] : memref<16x512xf32, #tpu.memory_space<vmem>>, vector<16x512xf32>
    tpu.vector_store %arg9[%c0_6, %c0_7], %8 {strides = array<i32>} : memref<16x512xf32, #tpu.memory_space<vmem>>, vector<16x512xf32>,
    return
  }
  func.func @transform_0(%arg0: i32, %arg1: i32) -> (i32, i32) {
    %c0_i32 = arith.constant 0 : i32
    %c0_i32_0 = arith.constant 0 : i32
    return %arg0, %c0_i32 : i32, i32
  }
  func.func @transform_1(%arg0: i32, %arg1: i32) -> (i32, i32) {
    %c0_i32 = arith.constant 0 : i32
    %c0_i32_0 = arith.constant 0 : i32
    %c0_i32_1 = arith.constant 0 : i32
    return %c0_i32, %c0_i32_0 : i32, i32
  }
  func.func @transform_2(%arg0: i32, %arg1: i32) -> (i32, i32) {
    %c0_i32 = arith.constant 0 : i32
    %c0_i32_0 = arith.constant 0 : i32
    %c0_i32_1 = arith.constant 0 : i32
    return %c0_i32, %c0_i32_0 : i32, i32
  }
  func.func @transform_3(%arg0: i32, %arg1: i32) -> (i32, i32) {
    %c0_i32 = arith.constant 0 : i32
    %c0_i32_0 = arith.constant 0 : i32
    %c0_i32_1 = arith.constant 0 : i32
    return %c0_i32, %c0_i32_0 : i32, i32
  }
  func.func @transform_4(%arg0: i32, %arg1: i32) -> (i32, i32) {
    %c0_i32 = arith.constant 0 : i32
    %c0_i32_0 = arith.constant 0 : i32
    %c0_i32_1 = arith.constant 0 : i32
    return %c0_i32, %c0_i32_0 : i32, i32
  }
  func.func @transform_5(%arg0: i32, %arg1: i32) -> (i32, i32) {
    %c0_i32 = arith.constant 0 : i32
    %c0_i32_0 = arith.constant 0 : i32
    return %c0_i32, %arg1 : i32, i32
  }
  func.func @transform_6(%arg0: i32, %arg1: i32) -> (i32, i32) {
    %c0_i32 = arith.constant 0 : i32
    %c0_i32_0 = arith.constant 0 : i32
    return %c0_i32, %arg1 : i32, i32
  }
  func.func @transform_7(%arg0: i32, %arg1: i32) -> (i32, i32) {
    %c0_i32 = arith.constant 0 : i32
    return %arg0, %arg1 : i32, i32
  }
}

</mosaic_0001>

<bundles_post_ra>
// kernel: tpu_custom_call.1
= control target key start
LH: loop header
LB: loop body
LE: loop exit
PB: predicated region body
PF: predicated region fallthrough
CT: control target
= control target key end

     0   :  { %s4291_s0 = inlined_call_operand.hbm [shape: bf16[16,32], index: 0, kind: input, shape index: {}]   ;;  %s4292_s1 = inlined_call_operand.hbm [shape: bf16[32,256], index: 1, kind: input, shape index: {}]   ;;  %s4293_s2 = inlined_call_operand.hbm [shape: f32[1,256], index: 2, kind: input, shape index: {}]   ;;  %s4294_s3 = inlined_call_operand.hbm [shape: bf16[256,512], index: 3, kind: input, shape index: {}]   ;;  %s4295_s4 = inlined_call_operand.hbm [shape: f32[1,512], index: 4, kind: input, shape index: {}]   ;;  %s4296_s5 = inlined_call_operand.hbm [shape: bf16[512,2560], index: 5, kind: input, shape index: {}]   ;;  %s4297_s6 = inlined_call_operand.hbm [shape: f32[1,2560], index: 6, kind: input, shape index: {}]   ;;  %s4298_s7 = inlined_call_operand.hbm [shape: f32[16,2560], index: 7, kind: output, shape index: {}]  }
   0x1   :  { %4307 = sst [smem:[#allocation26_spill]] %s4292_s1 }
   0x2   :  { %4308 = sst [smem:[#allocation27_spill]] %s4294_s3 }
   0x3   :  { %4309 = sst [smem:[#allocation28_spill]] %s4296_s5 }
   0x4   :  { %12 = vsyncpa [#allocation4], 0 }
   0x5   :  { %13 = vsyncpa [#allocation7], 0 }
   0x6   :  { %14 = vsyncpa [#allocation10], 0 }
   0x7   :  { %15 = vsyncpa [#allocation13], 0 }
   0x8   :  { %17 = vsyncpa [#allocation13 + $0x1], 0 }
   0x9   :  { %18 = vsyncpa [#allocation5], 0 }
   0xa   :  { %20 = vsyncpa [#allocation5 + $0x1], 0  ;;  %s3779_s24 = smov 0   ;;  %s3781_s25 = smov 0  }
   0xb   :  { %s3783_s26 = smov 0   ;;  %s3785_s27 = smov 0  }
   0xc   :  { %s3787_s28 = smov 0   ;;  %s3789_s29 = smov 0  }
   0xd LB: > { %4310 = sst [smem:[#allocation21_spill]] %s3702_s24  ;;  %s3810_s30 = sadd.s32 4294967295, %s3722_s29   ;;  %s3722_s29 = sphi %s3789_s29, %s26_s29   ;;  %s3718_s28 = sphi %s3787_s28, %s4337_s28   ;;  %s3714_s27 = sphi %s3785_s27, %s4336_s27   ;;  %s3710_s26 = sphi %s3783_s26, %s4335_s26   ;;  %s3706_s25 = sphi %s3781_s25, %s4334_s25   ;;  %s3702_s24 = sphi %s3779_s24, %s4333_s24  }
   0xe   : > { %4311 = sst [smem:[#allocation22_spill]] %s3722_s29  ;;  %s2253_s8 = sadd.s32 4294967294, %s3722_s29  }
   0xf   : > { %p168_p0 = scmp.ne.s32.totalorder %s3706_s25, %s3702_s24  ;;  %p169_p1 = scmp.eq.s32.totalorder %s3810_s30, 0 }
  0x10   : > { %p220_p2 = scmp.eq.s32.totalorder %s3810_s30, 4  ;;  %p226_p3 = scmp.eq.s32.totalorder %s2253_s8, 4 }
  0x11   : > { %p3819_p4 = por %p169_p1, %p168_p0  ;;  %p2254_p5 = scmp.ge.s32.totalorder %s3722_s29, 1 }
  0x12   : > { %p3824_p6 = por %p226_p3, %p168_p0  ;;  %p233_p7 = scmp.lt.s32.totalorder %s3722_s29, 6 }
  0x13   : > { %s4315_s1 = sld [smem:[#allocation26_spill]]  ;;  %s3724_s15 = smov [#allocation6]  }
  0x14   : > { %s4313_s10 = scalar_select %p3824_p6, 1, 0 }
  0x15   : > { %p3832_p8 = pnand %p2254_p5, %p233_p7  ;;  %s263_s16 = sshll.u32 %s3724_s15, 4  ;;  %s264_s16 = int_to_ptr.vmem [resolvable:$true] %s263_s16 }
  0x16   : > { %4314 = sst [smem:[#allocation23_spill]] %s4313_s10  ;;  %s3725_s21 = smov 128  }
  0x17   : > { %p3316_p9 = pneg %p3832_p8  ;;  %s4318_s3 = sld [smem:[#allocation27_spill]] }
  0x18   : > { %s3726_s22 = smov 8   ;;  %s3727_s23 = smov [#allocation9]  }
  0x19   : > { %s261_s13 = sshll.u32 %s4315_s1, 4  ;;  %p3840_p10 = pnand %p3316_p9, %p169_p1  ;;  %s262_s13 = int_to_ptr.hbm [resolvable:$true] %s261_s13 }
  0x1a   : > { %s289_s8 = sshll.u32 %s3727_s23, 4  ;;  %s4299_s11 = smov 256   ;;  %s290_s8 = int_to_ptr.vmem [resolvable:$true] %s289_s8 }
  0x1b   : > { %3322 = dma.hbm_to_vmem [thread:$0]  (!%p3840_p10), %s262_s13, 512, %s264_s16, [#allocation7], %s3725_s21, %s3725_s21, %s3726_s22  }
  0x1c   : > { %s4300_s12 = smov 16   ;;  %s35_s15 = sadd.s32 1, %s3718_s28 }
  0x1d   : > { %s287_s20 = sshll.u32 %s4318_s3, 4  ;;  %s155_s18 = sadd.s32 1, %s3710_s26  ;;  %s288_s20 = int_to_ptr.hbm [resolvable:$true] %s287_s20 }
  0x1e   : > { %3328 = dma.hbm_to_vmem [thread:$0]  (!%p3840_p10), %s288_s20, 8192, %s290_s8, [#allocation10], %s4299_s11, %s4299_s11, %s4300_s12  }
  0x1f   : > { %p36_p11 = scmp.ge.s32.totalorder %s35_s15, 5  ;;  %p162_p12 = scmp.ne.s32.totalorder %s3710_s26, %s3706_s25 }
  0x20   : > { %p163_p13 = scmp.eq.s32.totalorder %s3722_s29, 0  ;;  %p3348_p0 = scmp.lt.s32.totalorder %s3722_s29, 5 }
  0x21   : > { %s4339_s15 = smov (%p36_p11, %s35_s15), 0  ;;  %p3868_p5 = por %p220_p2, %p162_p12 }
  0x22   : > { %4319 = sst [smem:[#allocation24_spill]] %s4339_s15  ;;  %p3862_p3 = por %p163_p13, %p162_p12 }
  0x23   : > { %s152_s19 = ssub.s32 %s3718_s28, %s4339_s15  ;;  %s315_s20 = sand.u32 1, %s3722_s29  }
  0x24   : > { %p153_p7 = scmp.eq.s32.totalorder %s152_s19, 0  ;;  %s4303_s21 = sand.u32 1, %s3710_s26  }
  0x25   : > { %s3087_s22 = sshll.u32 %s3718_s28, 4  ;;  %s2261_s8 = sshll.u32 %s4303_s21, 10 }
  0x26   : > { %s3878_s23 = scalar_select %p153_p7, %s3710_s26, %s155_s18  }
  0x27   : > { %s4323_s5 = sld [smem:[#allocation28_spill]]  ;;  %s319_s10 = scalar_lea.vmem [#allocation12], %s2261_s8 }
  0x28   : > { %4322 = sst [smem:[#allocation25_spill]] %s3878_s23  ;;  %s327_s24 = sshll.u32 %s319_s10, 4  ;;  %s328_s24 = int_to_ptr.vmem [resolvable:$true] %s327_s24 }
  0x29   : > { %p3889_p2 = pnand %p3348_p0, %p3862_p3  ;;  %s3893_s18 = scalar_lea.sflag [#allocation13], %s315_s20 }
  0x2a   : > { %s3730_s21 = smov 1280   ;;  %s4325_s11 = smov 16  }
  0x2b   : > { %s4326_s12 = smov 256   ;;  %s247_s10 = sshll.u32 %s4291_s0, 4  ;;  %s248_s10 = int_to_ptr.hbm [resolvable:$true] %s247_s10 }
  0x2c   : > { %s3731_s13 = smov [#allocation3]   ;;  %s276_s20 = sshll.u32 %s4293_s2, 4  ;;  %s277_s20 = int_to_ptr.hbm [resolvable:$true] %s276_s20 }
  0x2d   : > { %s324_s1 = scalar_lea.hbm %s4323_s5, %s3087_s22  ;;  %s249_s8 = sshll.u32 %s3731_s13, 4  ;;  %s250_s8 = int_to_ptr.vmem [resolvable:$true] %s249_s8 }
  0x2e   : > { %s325_s3 = sshll.u32 %s324_s1, 4  ;;  %s3732_s23 = smov 64   ;;  %s326_s3 = int_to_ptr.hbm [resolvable:$true] %s325_s3 }
  0x2f   : > { %3335 = dma.hbm_to_vmem [thread:$0]  (!%p3889_p2), %s326_s3, 16384, %s328_s24, %s3893_s18, %s3730_s21, %s4326_s12, %s4325_s11  }
  0x30   : > { %s3733_s29 = smov 4   ;;  %s3734_s3 = smov [#allocation8]  }
  0x31   : > { %3319 = dma.hbm_to_vmem [thread:$0]  (!%p3840_p10), %s248_s10, 128, %s250_s8, [#allocation4], %s3732_s23, %s3732_s23, %s3733_s29  }
  0x32   : > { %s278_s24 = sshll.u32 %s3734_s3, 4  ;;  %s302_s12 = sshll.u32 %s4295_s4, 4  ;;  %s279_s24 = int_to_ptr.vmem [resolvable:$true] %s278_s24  ;;  %s303_s12 = int_to_ptr.hbm [resolvable:$true] %s302_s12 }
  0x33   : > { %3325 = dma.hbm_to_vmem [thread:$0]  (!%p3840_p10), %s277_s20, 32, %s279_s24, [#allocation7]  }
  0x34   : > { %s4327_s5 = sand.u32 1, %s3710_s26   ;;  %s3735_s1 = smov [#allocation11]  }
  0x35   : > { %s2264_s15 = sshll.u32 %s4327_s5, 2  ;;  %s304_s22 = sshll.u32 %s3735_s1, 4  ;;  %s305_s22 = int_to_ptr.vmem [resolvable:$true] %s304_s22 }
  0x36   : > { %s2265_s13 = sshll.u32 %s3718_s28, 2  ;;  %s341_s8 = scalar_lea.vmem [#allocation14], %s2264_s15 }
  0x37   : > { %3331 = dma.hbm_to_vmem [thread:$0]  (!%p3840_p10), %s303_s12, 64, %s305_s22, [#allocation10]  }
  0x38   : > { %s345_s10 = scalar_lea.hbm %s4297_s6, %s2265_s13  ;;  %s349_s3 = sshll.u32 %s341_s8, 4  ;;  %s350_s3 = int_to_ptr.vmem [resolvable:$true] %s349_s3 }
  0x39   : > { %s347_s21 = sshll.u32 %s345_s10, 4  ;;  %358 = sbr.rel (%p3832_p8) target bundleno = 676 (0x2a4), region = 48  ;;  %s348_s21 = int_to_ptr.hbm [resolvable:$true] %s347_s21 }
  0x3a   : > { %3338 = dma.hbm_to_vmem [thread:$0]  (!%p3889_p2), %s348_s21, 64, %s350_s3, %s3893_s18  }
  0x3e   : > { %3681 = dma.done.wait (%p169_p1), [#allocation4], 128  }
  0x3f   : > { %3683 = vsyncadd (%p169_p1), [#allocation4], 4294967168 }
  0x40   : > { %3685 = dma.done.wait (%p169_p1), [#allocation7], 544  }
  0x41   : > { %3687 = vsyncadd (%p169_p1), [#allocation7], 4294966752 }
  0x42   : > { %3689 = dma.done.wait (%p169_p1), [#allocation10], 8256  }
  0x43   : > { %3691 = vsyncadd (%p169_p1), [#allocation10], 4294959040  ;;  %s385_s14 = sand.u32 1, %s3810_s30   ;;  %s3940_s17 = sand.u32 1, %s3706_s25  }
  0x44   : > { %s2272_s19 = sshll.u32 %s3940_s17, 10  ;;  %s386_s18 = scalar_lea.sflag [#allocation13], %s385_s14 }
  0x45   : > { %s3943_s20 = scalar_lea.vmem [#allocation12], %s2272_s19 }
  0x46   : > { %3693 = dma.done.wait (%p3819_p4), %s386_s18, 16448  }
  0x47   : > { %3695 = vsyncadd (%p3819_p4), %s386_s18, 4294950848  ;;  %s2273_s24 = sshll.u32 %s3940_s17, 2  ;;  %s2274_s11 = sshll.u32 %s3940_s17, 6 }
  0x48   : > { %s3951_s12 = scalar_lea.vmem [#allocation14], %s2273_s24  ;;  %s3953_s5 = scalar_lea.vmem [#allocation15], %s2274_s11 }
  0x49   : > { %p2275_p1 = scmp.ne.s32.totalorder %s3714_s27, 0 }
  0x4b   : > { %445 = sbr.rel (%p2275_p1) target bundleno = 395 (0x18b), region = 80 }
  0x50   : > { %v2290_v0 = vld [vmem:[#allocation6 + $0x10] sm:$0xf]  ;;  %v3092_v1 = vld [vmem:[#allocation6 + $0x14] sm:$0xf0]  ;;  %v3091_v2 = vld [vmem:[#allocation6 + $0x14] sm:$0xf] }
  0x51   : > { %v2291_v3 = vor.u32 %v3092_v1, %v2290_v0  ;;  %v2292_v4 = vld [vmem:[#allocation6 + $0x18] sm:$0xf0]  ;;  %v2282_v5 = vld [vmem:[#allocation6] sm:$0xf]  ;;  %v3090_v6 = vld [vmem:[#allocation6 + $0x4] sm:$0xf0] }
  0x52   : > { %v2295_v7 = vor.u32 %v3091_v2, %v2292_v4  ;;  %v3089_v8 = vld [vmem:[#allocation6 + $0x4] sm:$0xf]  ;;  %v2284_v9 = vld [vmem:[#allocation6 + $0x8] sm:$0xf0]  ;;  %vm483_vm0 = vcmask 261120   ;;  %v2283_v10 = vor.u32 %v3090_v6, %v2282_v5  ;;  %v3088_v15 = vld [vmem:[#allocation3] sm:$0xff] }
  0x53   : > { %493 = vmatpush.bf16.msra.mxu0 %v2291_v3  ;;  %v2412_v11 = vld [vmem:[#allocation9 + $0xe0] sm:$0xf]  ;;  %v3123_v12 = vld [vmem:[#allocation9 + $0xec] sm:$0xf0]  ;;  %v2287_v14 = vor.u32 %v3089_v8, %v2284_v9  ;;  %v3121_v18 = vld [vmem:[#allocation9 + $0xe4] sm:$0xf] }
  0x54   : > { %v2540_v13 = vld [vmem:[#allocation9 + $0x1e0] sm:$0xf]  ;;  %507 = vmatpush.bf16.msra.mxu1 %v2295_v7  ;;  %v2413_v16 = vor.u32 %v3123_v12, %v2412_v11  ;;  %v3155_v17 = vld [vmem:[#allocation9 + $0x1ec] sm:$0xf0]  ;;  %v2414_v19 = vld [vmem:[#allocation9 + $0xf0] sm:$0xf0] }
  0x55   : > { %v2541_v20 = vor.u32 %v3155_v17, %v2540_v13  ;;  %v2417_v21 = vor.u32 %v3121_v18, %v2414_v19  ;;  %v3153_v22 = vld [vmem:[#allocation9 + $0x1e4] sm:$0xf]  ;;  %v2542_v23 = vld [vmem:[#allocation9 + $0x1f0] sm:$0xf0]  ;;  %v2396_v24 = vld [vmem:[#allocation9 + $0xc0] sm:$0xf] }
  0x56   : > { %915 = vmatpush.bf16.msra.mxu2 %v2413_v16  ;;  %v2545_v25 = vor.u32 %v3153_v22, %v2542_v23  ;;  %v3119_v26 = vld [vmem:[#allocation9 + $0xcc] sm:$0xf0]  ;;  %v2524_v27 = vld [vmem:[#allocation9 + $0x1c0] sm:$0xf]  ;;  %v3117_v31 = vld [vmem:[#allocation9 + $0xc4] sm:$0xf] }
  0x57   : > { %v3151_v28 = vld [vmem:[#allocation9 + $0x1cc] sm:$0xf0]  ;;  %494 = vmatpush.bf16.msra.mxu0 %v2283_v10  ;;  %929 = vmatpush.bf16.msra.mxu3 %v2541_v20  ;;  %v2397_v29 = vor.u32 %v3119_v26, %v2396_v24  ;;  %v2398_v32 = vld [vmem:[#allocation9 + $0xd0] sm:$0xf0]  ;;  %v3149_v33 = vld [vmem:[#allocation9 + $0x1c4] sm:$0xf] }
  0x58   : > { %v2525_v30 = vor.u32 %v3151_v28, %v2524_v27  ;;  %508 = vmatpush.bf16.msra.mxu1 %v2287_v14  ;;  %v2401_v34 = vor.u32 %v3117_v31, %v2398_v32  ;;  %v2526_v35 = vld [vmem:[#allocation9 + $0x1d0] sm:$0xf0]  ;;  %v2380_v36 = vld [vmem:[#allocation9 + $0xa0] sm:$0xf]  ;;  %v3115_v37 = vld [vmem:[#allocation9 + $0xac] sm:$0xf0] }
  0x59   : > { %v2529_v38 = vor.u32 %v3149_v33, %v2526_v35  ;;  %v2508_v39 = vld [vmem:[#allocation9 + $0x1a0] sm:$0xf]  ;;  %v3147_v40 = vld [vmem:[#allocation9 + $0x1ac] sm:$0xf0]  ;;  %v3113_v41 = vld [vmem:[#allocation9 + $0xa4] sm:$0xf]  ;;  %v2381_v42 = vor.u32 %v3115_v37, %v2380_v36 }
  0x5a   : > { %2296 = vmatmul.msk.bf16.vlgmr.msra.gmra.mxu0 %vm483_vm0, %v3088_v15  ;;  %916 = vmatpush.bf16.msra.mxu2 %v2397_v29  ;;  %v2382_v43 = vld [vmem:[#allocation9 + $0xb0] sm:$0xf0]  ;;  %v3145_v44 = vld [vmem:[#allocation9 + $0x1a4] sm:$0xf]  ;;  %v2509_v46 = vor.u32 %v3147_v40, %v2508_v39  ;;  %v2364_v47 = vld [vmem:[#allocation9 + $0x80] sm:$0xf] }
  0x5b   : > { %943 = vmatpush.bf16.msrb.mxu0 %v2417_v21  ;;  %v2510_v45 = vld [vmem:[#allocation9 + $0x1b0] sm:$0xf0]  ;;  %2297 = vmatmul.msk.bf16.vlgmr.msra.gmra.mxu1 %vm483_vm0, %v3088_v15  ;;  %v3111_v48 = vld [vmem:[#allocation9 + $0x8c] sm:$0xf0]  ;;  %v2385_v49 = vor.u32 %v3113_v41, %v2382_v43  ;;  %v2492_v50 = vld [vmem:[#allocation9 + $0x180] sm:$0xf] }
  0x5c   : > { %957 = vmatpush.bf16.msrb.mxu1 %v2545_v25  ;;  %930 = vmatpush.bf16.msra.mxu3 %v2525_v30  ;;  %v3143_v51 = vld [vmem:[#allocation9 + $0x18c] sm:$0xf0]  ;;  %v2513_v52 = vor.u32 %v3145_v44, %v2510_v45  ;;  %v3109_v53 = vld [vmem:[#allocation9 + $0x84] sm:$0xf]  ;;  %v2366_v54 = vld [vmem:[#allocation9 + $0x90] sm:$0xf0]  ;;  %v2365_v55 = vor.u32 %v3111_v48, %v2364_v47 }
  0x5d   : > { %v3141_v56 = vld [vmem:[#allocation9 + $0x184] sm:$0xf]  ;;  %v2494_v57 = vld [vmem:[#allocation9 + $0x190] sm:$0xf0]  ;;  %v2493_v58 = vor.u32 %v3143_v51, %v2492_v50  ;;  %v2348_v59 = vld [vmem:[#allocation9 + $0x60] sm:$0xf]  ;;  %v2369_v61 = vor.u32 %v3109_v53, %v2366_v54 }
  0x5e   : > { %917 = vmatpush.bf16.msra.mxu2 %v2381_v42  ;;  %v3107_v60 = vld [vmem:[#allocation9 + $0x6c] sm:$0xf0]  ;;  %v2476_v62 = vld [vmem:[#allocation9 + $0x160] sm:$0xf]  ;;  %v2497_v0 = vor.u32 %v3141_v56, %v2494_v57  ;;  %v3105_v1 = vld [vmem:[#allocation9 + $0x64] sm:$0xf] }
  0x5f   : > { %944 = vmatpush.bf16.msrb.mxu0 %v2401_v34  ;;  %v3139_v63 = vld [vmem:[#allocation9 + $0x16c] sm:$0xf0]  ;;  %v2350_v2 = vld [vmem:[#allocation9 + $0x70] sm:$0xf0]  ;;  %v2349_v3 = vor.u32 %v3107_v60, %v2348_v59  ;;  %v3137_v4 = vld [vmem:[#allocation9 + $0x164] sm:$0xf] }
  0x60   : > { %958 = vmatpush.bf16.msrb.mxu1 %v2529_v38  ;;  %931 = vmatpush.bf16.msra.mxu3 %v2509_v46  ;;  %v2478_v5 = vld [vmem:[#allocation9 + $0x170] sm:$0xf0]  ;;  %v2477_v6 = vor.u32 %v3139_v63, %v2476_v62  ;;  %v2332_v7 = vld [vmem:[#allocation9 + $0x40] sm:$0xf]  ;;  %v3103_v8 = vld [vmem:[#allocation9 + $0x4c] sm:$0xf0]  ;;  %v2353_v9 = vor.u32 %v3105_v1, %v2350_v2 }
  0x61   : > { %v2460_v10 = vld [vmem:[#allocation9 + $0x140] sm:$0xf]  ;;  %v3135_v11 = vld [vmem:[#allocation9 + $0x14c] sm:$0xf0]  ;;  %v2481_v12 = vor.u32 %v3137_v4, %v2478_v5  ;;  %v3101_v13 = vld [vmem:[#allocation9 + $0x44] sm:$0xf]  ;;  %v2333_v15 = vor.u32 %v3103_v8, %v2332_v7 }
  0x62   : > { %918 = vmatpush.bf16.msra.mxu2 %v2365_v55  ;;  %v2334_v14 = vld [vmem:[#allocation9 + $0x50] sm:$0xf0]  ;;  %v3133_v16 = vld [vmem:[#allocation9 + $0x144] sm:$0xf]  ;;  %v2461_v18 = vor.u32 %v3135_v11, %v2460_v10  ;;  %v2316_v19 = vld [vmem:[#allocation9 + $0x20] sm:$0xf] }
  0x63   : > { %945 = vmatpush.bf16.msrb.mxu0 %v2385_v49  ;;  %v2462_v17 = vld [vmem:[#allocation9 + $0x150] sm:$0xf0]  ;;  %v3099_v20 = vld [vmem:[#allocation9 + $0x2c] sm:$0xf0]  ;;  %v2337_v21 = vor.u32 %v3101_v13, %v2334_v14  ;;  %v2444_v22 = vld [vmem:[#allocation9 + $0x120] sm:$0xf] }
  0x64   : > { %959 = vmatpush.bf16.msrb.mxu1 %v2513_v52  ;;  %932 = vmatpush.bf16.msra.mxu3 %v2493_v58  ;;  %v3131_v23 = vld [vmem:[#allocation9 + $0x12c] sm:$0xf0]  ;;  %v2465_v24 = vor.u32 %v3133_v16, %v2462_v17  ;;  %v3097_v25 = vld [vmem:[#allocation9 + $0x24] sm:$0xf]  ;;  %v2318_v26 = vld [vmem:[#allocation9 + $0x30] sm:$0xf0]  ;;  %v2317_v27 = vor.u32 %v3099_v20, %v2316_v19 }
  0x65   : > { %v3129_v28 = vld [vmem:[#allocation9 + $0x124] sm:$0xf]  ;;  %v2446_v29 = vld [vmem:[#allocation9 + $0x130] sm:$0xf0]  ;;  %v2445_v30 = vor.u32 %v3131_v23, %v2444_v22  ;;  %v2300_v31 = vld [vmem:[#allocation9] sm:$0xf]  ;;  %v2321_v33 = vor.u32 %v3097_v25, %v2318_v26 }
  0x66   : > { %919 = vmatpush.bf16.msra.mxu2 %v2349_v3  ;;  %v3095_v32 = vld [vmem:[#allocation9 + $0xc] sm:$0xf0]  ;;  %v2428_v34 = vld [vmem:[#allocation9 + $0x100] sm:$0xf]  ;;  %v2449_v36 = vor.u32 %v3129_v28, %v2446_v29  ;;  %v3093_v37 = vld [vmem:[#allocation9 + $0x4] sm:$0xf] }
  0x67   : > { %946 = vmatpush.bf16.msrb.mxu0 %v2369_v61  ;;  %v3127_v35 = vld [vmem:[#allocation9 + $0x10c] sm:$0xf0]  ;;  %v2302_v38 = vld [vmem:[#allocation9 + $0x10] sm:$0xf0]  ;;  %v2301_v39 = vor.u32 %v3095_v32, %v2300_v31  ;;  %v3125_v40 = vld [vmem:[#allocation9 + $0x104] sm:$0xf] }
  0x68   : > { %960 = vmatpush.bf16.msrb.mxu1 %v2497_v0  ;;  %933 = vmatpush.bf16.msra.mxu3 %v2477_v6  ;;  %v2430_v41 = vld [vmem:[#allocation9 + $0x110] sm:$0xf0]  ;;  %v2429_v42 = vor.u32 %v3127_v35, %v2428_v34  ;;  %v2305_v43 = vor.u32 %v3093_v37, %v2302_v38  ;;  %v2420_v45 = vld [vmem:[#allocation9 + $0xe8] sm:$0xf]  ;;  %v3124_v46 = vld [vmem:[#allocation9 + $0xf4] sm:$0xf0] }
  0x69   : > { %v2433_v44 = vor.u32 %v3125_v40, %v2430_v41  ;;  %v2548_v47 = vld [vmem:[#allocation9 + $0x1e8] sm:$0xf]  ;;  %v2421_v48 = vor.u32 %v3124_v46, %v2420_v45  ;;  %v3156_v49 = vld [vmem:[#allocation9 + $0x1f4] sm:$0xf0]  ;;  %v3122_v50 = vld [vmem:[#allocation9 + $0xec] sm:$0xf] }
  0x6a   : > { %920 = vmatpush.bf16.msra.mxu2 %v2333_v15  ;;  %v2422_v51 = vld [vmem:[#allocation9 + $0xf8] sm:$0xf0]  ;;  %v2549_v52 = vor.u32 %v3156_v49, %v2548_v47  ;;  %v3154_v54 = vld [vmem:[#allocation9 + $0x1ec] sm:$0xf]  ;;  %v2404_v57 = vld [vmem:[#allocation9 + $0xc8] sm:$0xf] }
  0x6b   : > { %947 = vmatpush.bf16.msrb.mxu0 %v2353_v9  ;;  %v2425_v53 = vor.u32 %v3122_v50, %v2422_v51  ;;  %v2550_v55 = vld [vmem:[#allocation9 + $0x1f8] sm:$0xf0]  ;;  %v3120_v58 = vld [vmem:[#allocation9 + $0xd4] sm:$0xf0]  ;;  %v2532_v60 = vld [vmem:[#allocation9 + $0x1c8] sm:$0xf] }
  0x6c   : > { %961 = vmatpush.bf16.msrb.mxu1 %v2481_v12  ;;  %934 = vmatpush.bf16.msra.mxu3 %v2461_v18  ;;  %v2553_v56 = vor.u32 %v3154_v54, %v2550_v55  ;;  %v2405_v59 = vor.u32 %v3120_v58, %v2404_v57  ;;  %v3152_v61 = vld [vmem:[#allocation9 + $0x1d4] sm:$0xf0]  ;;  %v3118_v62 = vld [vmem:[#allocation9 + $0xcc] sm:$0xf]  ;;  %v2406_v0 = vld [vmem:[#allocation9 + $0xd8] sm:$0xf0] }
  0x6d   : > { %v2533_v63 = vor.u32 %v3152_v61, %v2532_v60  ;;  %v3150_v1 = vld [vmem:[#allocation9 + $0x1cc] sm:$0xf]  ;;  %v2534_v2 = vld [vmem:[#allocation9 + $0x1d8] sm:$0xf0]  ;;  %v2409_v3 = vor.u32 %v3118_v62, %v2406_v0  ;;  %v2388_v5 = vld [vmem:[#allocation9 + $0xa8] sm:$0xf] }
  0x6e   : > { %921 = vmatpush.bf16.msra.mxu2 %v2317_v27  ;;  %v2537_v4 = vor.u32 %v3150_v1, %v2534_v2  ;;  %v3116_v6 = vld [vmem:[#allocation9 + $0xb4] sm:$0xf0]  ;;  %v2516_v7 = vld [vmem:[#allocation9 + $0x1a8] sm:$0xf]  ;;  %v3114_v10 = vld [vmem:[#allocation9 + $0xac] sm:$0xf] }
  0x6f   : > { %948 = vmatpush.bf16.msrb.mxu0 %v2337_v21  ;;  %v2389_v8 = vor.u32 %v3116_v6, %v2388_v5  ;;  %v3148_v9 = vld [vmem:[#allocation9 + $0x1b4] sm:$0xf0]  ;;  %v2390_v11 = vld [vmem:[#allocation9 + $0xb8] sm:$0xf0]  ;;  %v3146_v14 = vld [vmem:[#allocation9 + $0x1ac] sm:$0xf] }
  0x70   : > { %962 = vmatpush.bf16.msrb.mxu1 %v2465_v24  ;;  %935 = vmatpush.bf16.msra.mxu3 %v2445_v30  ;;  %v2517_v12 = vor.u32 %v3148_v9, %v2516_v7  ;;  %v2393_v13 = vor.u32 %v3114_v10, %v2390_v11  ;;  %v2518_v15 = vld [vmem:[#allocation9 + $0x1b8] sm:$0xf0]  ;;  %v2372_v17 = vld [vmem:[#allocation9 + $0x88] sm:$0xf]  ;;  %v3112_v18 = vld [vmem:[#allocation9 + $0x94] sm:$0xf0] }
  0x71   : > { %v2521_v16 = vor.u32 %v3146_v14, %v2518_v15  ;;  %v2500_v19 = vld [vmem:[#allocation9 + $0x188] sm:$0xf]  ;;  %v2373_v20 = vor.u32 %v3112_v18, %v2372_v17  ;;  %v3144_v21 = vld [vmem:[#allocation9 + $0x194] sm:$0xf0]  ;;  %v3110_v22 = vld [vmem:[#allocation9 + $0x8c] sm:$0xf] }
  0x72   : > { %922 = vmatpush.bf16.msra.mxu2 %v2301_v39  ;;  %v2374_v23 = vld [vmem:[#allocation9 + $0x98] sm:$0xf0]  ;;  %v2501_v24 = vor.u32 %v3144_v21, %v2500_v19  ;;  %v3142_v26 = vld [vmem:[#allocation9 + $0x18c] sm:$0xf]  ;;  %v2356_v29 = vld [vmem:[#allocation9 + $0x68] sm:$0xf] }
  0x73   : > { %949 = vmatpush.bf16.msrb.mxu0 %v2321_v33  ;;  %v2377_v25 = vor.u32 %v3110_v22, %v2374_v23  ;;  %v2502_v27 = vld [vmem:[#allocation9 + $0x198] sm:$0xf0]  ;;  %v3108_v30 = vld [vmem:[#allocation9 + $0x74] sm:$0xf0]  ;;  %v2484_v31 = vld [vmem:[#allocation9 + $0x168] sm:$0xf] }
  0x74   : > { %963 = vmatpush.bf16.msrb.mxu1 %v2449_v36  ;;  %936 = vmatpush.bf16.msra.mxu3 %v2429_v42  ;;  %v2505_v28 = vor.u32 %v3142_v26, %v2502_v27  ;;  %v2357_v32 = vor.u32 %v3108_v30, %v2356_v29  ;;  %v3140_v33 = vld [vmem:[#allocation9 + $0x174] sm:$0xf0]  ;;  %v3106_v34 = vld [vmem:[#allocation9 + $0x6c] sm:$0xf]  ;;  %v2358_v35 = vld [vmem:[#allocation9 + $0x78] sm:$0xf0] }
  0x75   : > { %v2485_v36 = vor.u32 %v3140_v33, %v2484_v31  ;;  %v2361_v37 = vor.u32 %v3106_v34, %v2358_v35  ;;  %v3138_v38 = vld [vmem:[#allocation9 + $0x16c] sm:$0xf]  ;;  %v2486_v39 = vld [vmem:[#allocation9 + $0x178] sm:$0xf0]  ;;  %v2340_v40 = vld [vmem:[#allocation9 + $0x48] sm:$0xf] }
  0x76   : > { %971 = vmatpush.bf16.msrb.mxu2 %v2421_v48  ;;  %v2489_v41 = vor.u32 %v3138_v38, %v2486_v39  ;;  %v3104_v42 = vld [vmem:[#allocation9 + $0x54] sm:$0xf0]  ;;  %v3102_v47 = vld [vmem:[#allocation9 + $0x4c] sm:$0xf]  ;;  %v2342_v48 = vld [vmem:[#allocation9 + $0x58] sm:$0xf0] }
  0x77   : > { %950 = vmatpush.bf16.msrb.mxu0 %v2305_v43  ;;  %v2468_v43 = vld [vmem:[#allocation9 + $0x148] sm:$0xf]  ;;  %v2341_v45 = vor.u32 %v3104_v42, %v2340_v40  ;;  %v3134_v49 = vld [vmem:[#allocation9 + $0x14c] sm:$0xf]  ;;  %v2345_v50 = vor.u32 %v3102_v47, %v2342_v48  ;;  %v2470_v51 = vld [vmem:[#allocation9 + $0x158] sm:$0xf0] }
  0x78   : > { %964 = vmatpush.bf16.msrb.mxu1 %v2433_v44  ;;  %985 = vmatpush.bf16.msrb.mxu3 %v2549_v52  ;;  %v3136_v44 = vld [vmem:[#allocation9 + $0x154] sm:$0xf0]  ;;  %v2324_v52 = vld [vmem:[#allocation9 + $0x28] sm:$0xf]  ;;  %v2473_v54 = vor.u32 %v3134_v49, %v2470_v51  ;;  %v3098_v57 = vld [vmem:[#allocation9 + $0x2c] sm:$0xf] }
  0x79   : > { %v2469_v46 = vor.u32 %v3136_v44, %v2468_v43  ;;  %v2452_v55 = vld [vmem:[#allocation9 + $0x128] sm:$0xf]  ;;  %v3130_v60 = vld [vmem:[#allocation9 + $0x12c] sm:$0xf]  ;;  %v2454_v61 = vld [vmem:[#allocation9 + $0x138] sm:$0xf0] }
  0x7a   : > { %972 = vmatpush.bf16.msrb.mxu2 %v2405_v59  ;;  %v2326_v59 = vld [vmem:[#allocation9 + $0x38] sm:$0xf0]  ;;  %v3096_v0 = vld [vmem:[#allocation9 + $0x14] sm:$0xf0]  ;;  %v2457_v2 = vor.u32 %v3130_v60, %v2454_v61  ;;  %v3094_v5 = vld [vmem:[#allocation9 + $0xc] sm:$0xf] }
  0x7b   : > { %999 = vmatpush.bf16.msra.mxu0 %v2425_v53  ;;  %v3100_v53 = vld [vmem:[#allocation9 + $0x34] sm:$0xf0]  ;;  %v2329_v1 = vor.u32 %v3098_v57, %v2326_v59  ;;  %v2310_v6 = vld [vmem:[#allocation9 + $0x18] sm:$0xf0]  ;;  %v3126_v7 = vld [vmem:[#allocation9 + $0x10c] sm:$0xf] }
  0x7c   : > { %1013 = vmatpush.bf16.msra.mxu1 %v2553_v56  ;;  %986 = vmatpush.bf16.msrb.mxu3 %v2533_v63  ;;  %v3132_v56 = vld [vmem:[#allocation9 + $0x134] sm:$0xf0]  ;;  %v2325_v58 = vor.u32 %v3100_v53, %v2324_v52  ;;  %v2308_v63 = vld [vmem:[#allocation9 + $0x8] sm:$0xf]  ;;  %v2313_v11 = vor.u32 %v3094_v5, %v2310_v6  ;;  %v585_v30 = vld [vmem:[#allocation11] sm:$0xf] }
  0x7d   : > { %v2453_v62 = vor.u32 %v3132_v56, %v2452_v55  ;;  %v2309_v9 = vor.u32 %v3096_v0, %v2308_v63  ;;  %v588_v31 = vperm.slane %v585_v30, 1  ;;  %v587_v35 = vperm.slane %v585_v30, 0 }
  0x7e   : > { %973 = vmatpush.bf16.msrb.mxu2 %v2389_v8  ;;  %v2438_v8 = vld [vmem:[#allocation9 + $0x118] sm:$0xf0]  ;;  %v590_v51 = vperm.slane %v585_v30, 3  ;;  %v589_v57 = vperm.slane %v585_v30, 2 }
  0x7f   : > { %1000 = vmatpush.bf16.msra.mxu0 %v2409_v3  ;;  %v2436_v3 = vld [vmem:[#allocation9 + $0x108] sm:$0xf] }
  0x80   : > { %1014 = vmatpush.bf16.msra.mxu1 %v2537_v4  ;;  %987 = vmatpush.bf16.msrb.mxu3 %v2517_v12  ;;  %v3128_v4 = vld [vmem:[#allocation9 + $0x114] sm:$0xf0]  ;;  %v2441_v12 = vor.u32 %v3126_v7, %v2438_v8 }
  0x81   : > { %v2437_v10 = vor.u32 %v3128_v4, %v2436_v3 }
  0x82   : > { %974 = vmatpush.bf16.msrb.mxu2 %v2373_v20 }
  0x83   : > { %1001 = vmatpush.bf16.msra.mxu0 %v2393_v13  ;;  %v452_v13 = vld [vmem:[#allocation8] sm:$0x3] }
  0x84   : > { %1015 = vmatpush.bf16.msra.mxu1 %v2521_v16  ;;  %988 = vmatpush.bf16.msrb.mxu3 %v2501_v24  ;;  %v454_v16 = vperm.slane %v452_v13, 0  ;;  %v455_v17 = vperm.slane %v452_v13, 1 }
  0x86   : > { %975 = vmatpush.bf16.msrb.mxu2 %v2357_v32 }
  0x87   : > { %1002 = vmatpush.bf16.msra.mxu0 %v2377_v25 }
  0x88   : > { %1016 = vmatpush.bf16.msra.mxu1 %v2505_v28  ;;  %989 = vmatpush.bf16.msrb.mxu3 %v2485_v36 }
  0x8a   : > { %976 = vmatpush.bf16.msrb.mxu2 %v2341_v45 }
  0x8b   : > { %1003 = vmatpush.bf16.msra.mxu0 %v2361_v37 }
  0x8c   : > { %1017 = vmatpush.bf16.msra.mxu1 %v2489_v41  ;;  %990 = vmatpush.bf16.msrb.mxu3 %v2469_v46 }
  0x8e   : > { %977 = vmatpush.bf16.msrb.mxu2 %v2325_v58 }
  0x8f   : > { %1004 = vmatpush.bf16.msra.mxu0 %v2345_v50 }
  0x90   : > { %1018 = vmatpush.bf16.msra.mxu1 %v2473_v54  ;;  %991 = vmatpush.bf16.msrb.mxu3 %v2453_v62 }
  0x92   : > { %978 = vmatpush.bf16.msrb.mxu2 %v2309_v9 }
  0x93   : > { %1005 = vmatpush.bf16.msra.mxu0 %v2329_v1 }
  0x94   : > { %1019 = vmatpush.bf16.msra.mxu1 %v2457_v2  ;;  %992 = vmatpush.bf16.msrb.mxu3 %v2437_v10 }
  0x97   : > { %1006 = vmatpush.bf16.msra.mxu0 %v2313_v11 }
  0x98   : > { %1020 = vmatpush.bf16.msra.mxu1 %v2441_v12 }
  0xd7   : > { %v496_v14 = vpop.f32.mrf.mxu0 }
  0xd8   : > { %v510_v15 = vpop.f32.mrf.mxu1  ;;  %v497_v18 = vadd.f32 %v496_v14, %v454_v16 }
  0xd9   : > { %v511_v19 = vadd.f32 %v510_v15, %v455_v17 }
  0xda   : > { %v515_v24 = vmax.f32 %v497_v18, 0.0 }
  0xdb   : > { %v516_v26 = vmax.f32 %v511_v19, 0.0 }
  0xdf   : > { %v498_v20 = vpop.f32.mrf.mxu0 }
  0xe0   : > { %v499_v21 = vadd.f32 %v498_v20, %v454_v16  ;;  %v512_v22 = vpop.f32.mrf.mxu1 }
  0xe1   : > { %v513_v23 = vadd.f32 %v512_v22, %v455_v17 }
  0xe2   : > { %v517_v25 = vmax.f32 %v499_v21, 0.0 }
  0xe3   : > { %v518_v27 = vmax.f32 %v513_v23, 0.0 }
  0xe4   : > { %v519_v28 = vpack.c.bf16 %v517_v25, %v515_v24 }
  0xe5   : > { %v520_v29 = vpack.c.bf16 %v518_v27, %v516_v26 }
  0xe6   : > { %923 = vmatmul.bf16.vlgmr.msra.gmra.mxu2 %v519_v28  ;;  %951 = vmatmul.bf16.vlgmr.msrb.gmra.mxu0 %v519_v28 }
  0xe7   : > { %937 = vmatmul.bf16.vlgmr.msra.gmra.mxu3 %v520_v29  ;;  %965 = vmatmul.bf16.vlgmr.msrb.gmra.mxu1 %v520_v29 }
  0xf6   : > { %979 = vmatmul.bf16.vlgmr.msrb.gmra.mxu2 %v519_v28  ;;  %1007 = vmatmul.bf16.vlgmr.msra.gmra.mxu0 %v519_v28 }
  0xf7   : > { %993 = vmatmul.bf16.vlgmr.msrb.gmra.mxu3 %v520_v29  ;;  %1021 = vmatmul.bf16.vlgmr.msra.gmra.mxu1 %v520_v29 }
 0x163   : > { %v952_v32 = vpop.f32.mrf.mxu0 }
 0x164   : > { %v966_v33 = vpop.f32.mrf.mxu1  ;;  %v953_v34 = vadd.f32 %v952_v32, %v588_v31 }
 0x166   : > { %v967_v37 = vadd.f32 %v966_v33, %v953_v34 }
 0x168   : > { %v1028_v43 = vmax.f32 %v967_v37, 0.0 }
 0x169   : > { %v924_v36 = vpop.f32.mrf.mxu2 }
 0x16a   : > { %v925_v38 = vadd.f32 %v924_v36, %v587_v35  ;;  %v938_v39 = vpop.f32.mrf.mxu3 }
 0x16b   : > { %v954_v40 = vpop.f32.mrf.mxu0 }
 0x16c   : > { %v939_v41 = vadd.f32 %v938_v39, %v925_v38  ;;  %v968_v42 = vpop.f32.mrf.mxu1  ;;  %v955_v45 = vadd.f32 %v954_v40, %v588_v31 }
 0x16e   : > { %v1027_v44 = vmax.f32 %v939_v41, 0.0  ;;  %v969_v48 = vadd.f32 %v968_v42, %v955_v45 }
 0x170   : > { %v1035_v46 = vpack.c.bf16 %v1028_v43, %v1027_v44  ;;  %v1032_v54 = vmax.f32 %v969_v48, 0.0 }
 0x171   : > { %v926_v47 = vpop.f32.mrf.mxu2 }
 0x172   : > { %1039 = vst [vmem:[#allocation2] sm:$0xff] %v1035_v46  ;;  %v927_v49 = vadd.f32 %v926_v47, %v587_v35  ;;  %v940_v50 = vpop.f32.mrf.mxu3 }
 0x173   : > { %v1008_v52 = vpop.f32.mrf.mxu0 }
 0x174   : > { %v941_v53 = vadd.f32 %v940_v50, %v927_v49  ;;  %v1009_v56 = vadd.f32 %v1008_v52, %v590_v51  ;;  %v1022_v58 = vpop.f32.mrf.mxu1 }
 0x176   : > { %v1031_v55 = vmax.f32 %v941_v53, 0.0  ;;  %v1023_v61 = vadd.f32 %v1022_v58, %v1009_v56 }
 0x178   : > { %v1037_v59 = vpack.c.bf16 %v1032_v54, %v1031_v55  ;;  %v1030_v2 = vmax.f32 %v1023_v61, 0.0 }
 0x179   : > { %v980_v60 = vpop.f32.mrf.mxu2 }
 0x17a   : > { %1041 = vst [vmem:[#allocation2 + $0x10] sm:$0xff] %v1037_v59  ;;  %v981_v62 = vadd.f32 %v980_v60, %v589_v57  ;;  %v994_v63 = vpop.f32.mrf.mxu3 }
 0x17b   : > { %v1010_v0 = vpop.f32.mrf.mxu0 }
 0x17c   : > { %v995_v1 = vadd.f32 %v994_v63, %v981_v62  ;;  %v1011_v4 = vadd.f32 %v1010_v0, %v590_v51  ;;  %v1024_v6 = vpop.f32.mrf.mxu1 }
 0x17e   : > { %v1029_v3 = vmax.f32 %v995_v1, 0.0  ;;  %v1025_v8 = vadd.f32 %v1024_v6, %v1011_v4 }
 0x180   : > { %v1036_v5 = vpack.c.bf16 %v1030_v2, %v1029_v3  ;;  %v1034_v12 = vmax.f32 %v1025_v8, 0.0 }
 0x181   : > { %v982_v7 = vpop.f32.mrf.mxu2 }
 0x182   : > { %1040 = vst [vmem:[#allocation2 + $0x8] sm:$0xff] %v1036_v5  ;;  %v983_v9 = vadd.f32 %v982_v7, %v589_v57  ;;  %v996_v10 = vpop.f32.mrf.mxu3 }
 0x184   : > { %v997_v11 = vadd.f32 %v996_v10, %v983_v9 }
 0x186   : > { %v1033_v13 = vmax.f32 %v997_v11, 0.0 }
 0x188   : > { %v1038_v14 = vpack.c.bf16 %v1034_v12, %v1033_v13 }
 0x18a   : > { %1042 = vst [vmem:[#allocation2 + $0x18] sm:$0xff] %v1038_v14 }
 0x18b PF: > { %v2684_v15 = vld [vmem:[%s3943_s20 + $0xe0] sm:$0xf]  ;;  %v3191_v16 = vld [vmem:[%s3943_s20 + $0xec] sm:$0xf0]  ;;  %s3289_s30 = sshll.u32 %s3714_s27, 5  ;;  %s2093_s22 = sshll.u32 %s3953_s5, 4  ;;  %s2094_s22 = int_to_ptr.vmem [resolvable:$true] %s2093_s22 }
 0x18c   : > { %v2812_v17 = vld [vmem:[%s3943_s20 + $0x1e0] sm:$0xf]  ;;  %v2685_v18 = vor.u32 %v3191_v16, %v2684_v15  ;;  %v3223_v19 = vld [vmem:[%s3943_s20 + $0x1ec] sm:$0xf0]  ;;  %s2092_s1 = scalar_lea.hbm %s4298_s7, %s3289_s30  ;;  %s2078_s27 = scalar_lea.sflag [#allocation5], %s3940_s17 }
 0x18d   : > { %v2940_v20 = vld [vmem:[%s3943_s20 + $0x2e0] sm:$0xf]  ;;  %v3255_v21 = vld [vmem:[%s3943_s20 + $0x2ec] sm:$0xf0]  ;;  %v2813_v22 = vor.u32 %v3223_v19, %v2812_v17  ;;  %s2095_s13 = sshll.u32 %s2092_s1, 4  ;;  %s3648_s3 = scalar_lea.hbm %s4298_s7, 320  ;;  %s2096_s13 = int_to_ptr.hbm [resolvable:$true] %s2095_s13 }
 0x18e   : > { %v2941_v23 = vor.u32 %v3255_v21, %v2940_v20  ;;  %v3068_v24 = vld [vmem:[%s3943_s20 + $0x3e0] sm:$0xf]  ;;  %v3287_v25 = vld [vmem:[%s3943_s20 + $0x3ec] sm:$0xf0]  ;;  %1845 = vmatpush.bf16.msra.mxu0 %v2685_v18  ;;  %s3642_s29 = sshra.s32 %s2096_s13, 4  ;;  %s3643_s29 = int_to_ptr.hbm [resolvable:$true] %s3642_s29 }
 0x18f   : > { %v2668_v26 = vld [vmem:[%s3943_s20 + $0xc0] sm:$0xf]  ;;  %v3069_v27 = vor.u32 %v3287_v25, %v3068_v24  ;;  %v3187_v28 = vld [vmem:[%s3943_s20 + $0xcc] sm:$0xf0]  ;;  %1859 = vmatpush.bf16.msra.mxu1 %v2813_v22  ;;  %s3644_s23 = scalar_lea.hbm %s3643_s29, 64  ;;  %p3649_p10 = scmp.lt.s32.totalorder %s3643_s29, %s4298_s7 }
 0x190   : > { %v2796_v29 = vld [vmem:[%s3943_s20 + $0x1c0] sm:$0xf]  ;;  %v3219_v30 = vld [vmem:[%s3943_s20 + $0x1cc] sm:$0xf0]  ;;  %1873 = vmatpush.bf16.msra.mxu2 %v2941_v23  ;;  %v2669_v31 = vor.u32 %v3187_v28, %v2668_v26  ;;  %p3645_p4 = scmp.ne.s32.totalorder %s3643_s29, %s3644_s23  ;;  %p3650_p11 = scmp.lt.s32.totalorder %s3648_s3, %s3644_s23 }
 0x191   : > { %v2797_v32 = vor.u32 %v3219_v30, %v2796_v29  ;;  %v2924_v33 = vld [vmem:[%s3943_s20 + $0x2c0] sm:$0xf]  ;;  %v3251_v34 = vld [vmem:[%s3943_s20 + $0x2cc] sm:$0xf0]  ;;  %1887 = vmatpush.bf16.msra.mxu3 %v3069_v27 }
 0x192   : > { %v3052_v35 = vld [vmem:[%s3943_s20 + $0x3c0] sm:$0xf]  ;;  %v2925_v36 = vor.u32 %v3251_v34, %v2924_v33  ;;  %v3283_v37 = vld [vmem:[%s3943_s20 + $0x3cc] sm:$0xf0]  ;;  %1846 = vmatpush.bf16.msra.mxu0 %v2669_v31  ;;  %p3646_p8 = pnand %p3645_p4, %p3868_p5  ;;  %p3651_p12 = por %p3650_p11, %p3649_p10 }
 0x193   : > { %v2652_v38 = vld [vmem:[%s3943_s20 + $0xa0] sm:$0xf]  ;;  %v3183_v39 = vld [vmem:[%s3943_s20 + $0xac] sm:$0xf0]  ;;  %v3053_v40 = vor.u32 %v3283_v37, %v3052_v35  ;;  %1860 = vmatpush.bf16.msra.mxu1 %v2797_v32 }
 0x194   : > { %v2780_v41 = vld [vmem:[%s3943_s20 + $0x1a0] sm:$0xf]  ;;  %v3215_v42 = vld [vmem:[%s3943_s20 + $0x1ac] sm:$0xf0]  ;;  %v2653_v44 = vor.u32 %v3183_v39, %v2652_v38  ;;  %1874 = vmatpush.bf16.msra.mxu2 %v2925_v36  ;;  %p3647_p9 = pneg %p3646_p8 }
 0x195   : > { %v2908_v43 = vld [vmem:[%s3943_s20 + $0x2a0] sm:$0xf]  ;;  %v3247_v45 = vld [vmem:[%s3943_s20 + $0x2ac] sm:$0xf0]  ;;  %v2781_v48 = vor.u32 %v3215_v42, %v2780_v41  ;;  %1888 = vmatpush.bf16.msra.mxu3 %v3053_v40 }
 0x196   : > { %v3036_v46 = vld [vmem:[%s3943_s20 + $0x3a0] sm:$0xf]  ;;  %v3279_v47 = vld [vmem:[%s3943_s20 + $0x3ac] sm:$0xf0]  ;;  %v2909_v49 = vor.u32 %v3247_v45, %v2908_v43  ;;  %1847 = vmatpush.bf16.msra.mxu0 %v2653_v44  ;;  %v3189_v43 = vld [vmem:[%s3943_s20 + $0xe4] sm:$0xf]  ;;  %p3652_p13 = pnand %p3651_p12, %p3647_p9 }
 0x197   : > { %v2636_v50 = vld [vmem:[%s3943_s20 + $0x80] sm:$0xf]  ;;  %v3179_v51 = vld [vmem:[%s3943_s20 + $0x8c] sm:$0xf0]  ;;  %v3037_v53 = vor.u32 %v3279_v47, %v3036_v46  ;;  %1861 = vmatpush.bf16.msra.mxu1 %v2781_v48  ;;  %v2686_v44 = vld [vmem:[%s3943_s20 + $0xf0] sm:$0xf0] }
 0x198   : > { %v2764_v52 = vld [vmem:[%s3943_s20 + $0x180] sm:$0xf]  ;;  %v3211_v54 = vld [vmem:[%s3943_s20 + $0x18c] sm:$0xf0]  ;;  %v2637_v59 = vor.u32 %v3179_v51, %v2636_v50  ;;  %1875 = vmatpush.bf16.msra.mxu2 %v2909_v49  ;;  %v3221_v45 = vld [vmem:[%s3943_s20 + $0x1e4] sm:$0xf] }
 0x199   : > { %v2892_v55 = vld [vmem:[%s3943_s20 + $0x280] sm:$0xf]  ;;  %v3243_v56 = vld [vmem:[%s3943_s20 + $0x28c] sm:$0xf0]  ;;  %v2765_v60 = vor.u32 %v3211_v54, %v2764_v52  ;;  %1889 = vmatpush.bf16.msra.mxu3 %v3037_v53  ;;  %v2814_v47 = vld [vmem:[%s3943_s20 + $0x1f0] sm:$0xf0] }
 0x19a   : > { %v3020_v57 = vld [vmem:[%s3943_s20 + $0x380] sm:$0xf]  ;;  %v3275_v58 = vld [vmem:[%s3943_s20 + $0x38c] sm:$0xf0]  ;;  %v2893_v61 = vor.u32 %v3243_v56, %v2892_v55  ;;  %1848 = vmatpush.bf16.msra.mxu0 %v2637_v59  ;;  %v3253_v48 = vld [vmem:[%s3943_s20 + $0x2e4] sm:$0xf]  ;;  %v2689_v55 = vor.u32 %v3189_v43, %v2686_v44  ;;  %v2817_v56 = vor.u32 %v3221_v45, %v2814_v47 }
 0x19b   : > { %v2620_v62 = vld [vmem:[%s3943_s20 + $0x60] sm:$0xf]  ;;  %v3175_v63 = vld [vmem:[%s3943_s20 + $0x6c] sm:$0xf0]  ;;  %v3021_v1 = vor.u32 %v3275_v58, %v3020_v57  ;;  %1862 = vmatpush.bf16.msra.mxu1 %v2765_v60  ;;  %v2942_v49 = vld [vmem:[%s3943_s20 + $0x2f0] sm:$0xf0] }
 0x19c   : > { %v2748_v0 = vld [vmem:[%s3943_s20 + $0x160] sm:$0xf]  ;;  %v3207_v2 = vld [vmem:[%s3943_s20 + $0x16c] sm:$0xf0]  ;;  %v2621_v7 = vor.u32 %v3175_v63, %v2620_v62  ;;  %1876 = vmatpush.bf16.msra.mxu2 %v2893_v61  ;;  %v3285_v52 = vld [vmem:[%s3943_s20 + $0x3e4] sm:$0xf]  ;;  %v2945_v57 = vor.u32 %v3253_v48, %v2942_v49 }
 0x19d   : > { %v2876_v3 = vld [vmem:[%s3943_s20 + $0x260] sm:$0xf]  ;;  %v3239_v4 = vld [vmem:[%s3943_s20 + $0x26c] sm:$0xf0]  ;;  %v2749_v8 = vor.u32 %v3207_v2, %v2748_v0  ;;  %1890 = vmatpush.bf16.msra.mxu3 %v3021_v1  ;;  %v3070_v53 = vld [vmem:[%s3943_s20 + $0x3f0] sm:$0xf0] }
 0x19e   : > { %v3004_v5 = vld [vmem:[%s3943_s20 + $0x360] sm:$0xf]  ;;  %v3271_v6 = vld [vmem:[%s3943_s20 + $0x36c] sm:$0xf0]  ;;  %v2877_v9 = vor.u32 %v3239_v4, %v2876_v3  ;;  %1849 = vmatpush.bf16.msra.mxu0 %v2621_v7  ;;  %v3185_v58 = vld [vmem:[%s3943_s20 + $0xc4] sm:$0xf]  ;;  %v3073_v61 = vor.u32 %v3285_v52, %v3070_v53 }
 0x19f   : > { %v2604_v10 = vld [vmem:[%s3943_s20 + $0x40] sm:$0xf]  ;;  %v3171_v11 = vld [vmem:[%s3943_s20 + $0x4c] sm:$0xf0]  ;;  %v3005_v13 = vor.u32 %v3271_v6, %v3004_v5  ;;  %1863 = vmatpush.bf16.msra.mxu1 %v2749_v8  ;;  %v2670_v59 = vld [vmem:[%s3943_s20 + $0xd0] sm:$0xf0] }
 0x1a0   : > { %v2732_v12 = vld [vmem:[%s3943_s20 + $0x140] sm:$0xf]  ;;  %v3203_v14 = vld [vmem:[%s3943_s20 + $0x14c] sm:$0xf0]  ;;  %v2605_v19 = vor.u32 %v3171_v11, %v2604_v10  ;;  %1877 = vmatpush.bf16.msra.mxu2 %v2877_v9  ;;  %v3217_v60 = vld [vmem:[%s3943_s20 + $0x1c4] sm:$0xf]  ;;  %v2673_v3 = vor.u32 %v3185_v58, %v2670_v59 }
 0x1a1   : > { %v2860_v15 = vld [vmem:[%s3943_s20 + $0x240] sm:$0xf]  ;;  %v3235_v16 = vld [vmem:[%s3943_s20 + $0x24c] sm:$0xf0]  ;;  %v2733_v20 = vor.u32 %v3203_v14, %v2732_v12  ;;  %1891 = vmatpush.bf16.msra.mxu3 %v3005_v13  ;;  %v2798_v62 = vld [vmem:[%s3943_s20 + $0x1d0] sm:$0xf0] }
 0x1a2   : > { %v2988_v17 = vld [vmem:[%s3943_s20 + $0x340] sm:$0xf]  ;;  %v3267_v18 = vld [vmem:[%s3943_s20 + $0x34c] sm:$0xf0]  ;;  %v2861_v21 = vor.u32 %v3235_v16, %v2860_v15  ;;  %1850 = vmatpush.bf16.msra.mxu0 %v2605_v19  ;;  %v3249_v63 = vld [vmem:[%s3943_s20 + $0x2c4] sm:$0xf]  ;;  %v2801_v5 = vor.u32 %v3217_v60, %v2798_v62 }
 0x1a3   : > { %v2588_v22 = vld [vmem:[%s3943_s20 + $0x20] sm:$0xf]  ;;  %v3167_v23 = vld [vmem:[%s3943_s20 + $0x2c] sm:$0xf0]  ;;  %v2989_v25 = vor.u32 %v3267_v18, %v2988_v17  ;;  %1864 = vmatpush.bf16.msra.mxu1 %v2733_v20  ;;  %v2926_v0 = vld [vmem:[%s3943_s20 + $0x2d0] sm:$0xf0] }
 0x1a4   : > { %v2716_v24 = vld [vmem:[%s3943_s20 + $0x120] sm:$0xf]  ;;  %v3199_v26 = vld [vmem:[%s3943_s20 + $0x12c] sm:$0xf0]  ;;  %v2589_v31 = vor.u32 %v3167_v23, %v2588_v22  ;;  %1878 = vmatpush.bf16.msra.mxu2 %v2861_v21  ;;  %v3281_v1 = vld [vmem:[%s3943_s20 + $0x3c4] sm:$0xf]  ;;  %v2929_v6 = vor.u32 %v3249_v63, %v2926_v0 }
 0x1a5   : > { %v2844_v27 = vld [vmem:[%s3943_s20 + $0x220] sm:$0xf]  ;;  %v3231_v28 = vld [vmem:[%s3943_s20 + $0x22c] sm:$0xf0]  ;;  %v2717_v34 = vor.u32 %v3199_v26, %v2716_v24  ;;  %1892 = vmatpush.bf16.msra.mxu3 %v2989_v25  ;;  %v3054_v2 = vld [vmem:[%s3943_s20 + $0x3d0] sm:$0xf0] }
 0x1a6   : > { %v2972_v29 = vld [vmem:[%s3943_s20 + $0x320] sm:$0xf]  ;;  %v3263_v30 = vld [vmem:[%s3943_s20 + $0x32c] sm:$0xf0]  ;;  %v2845_v35 = vor.u32 %v3231_v28, %v2844_v27  ;;  %1851 = vmatpush.bf16.msra.mxu0 %v2589_v31  ;;  %v3181_v4 = vld [vmem:[%s3943_s20 + $0xa4] sm:$0xf]  ;;  %v3057_v10 = vor.u32 %v3281_v1, %v3054_v2 }
 0x1a7   : > { %v2572_v32 = vld [vmem:[%s3943_s20] sm:$0xf]  ;;  %v3163_v33 = vld [vmem:[%s3943_s20 + $0xc] sm:$0xf0]  ;;  %v2973_v39 = vor.u32 %v3263_v30, %v2972_v29  ;;  %1865 = vmatpush.bf16.msra.mxu1 %v2717_v34  ;;  %v2654_v7 = vld [vmem:[%s3943_s20 + $0xb0] sm:$0xf0] }
 0x1a8   : > { %v2700_v36 = vld [vmem:[%s3943_s20 + $0x100] sm:$0xf]  ;;  %v3195_v37 = vld [vmem:[%s3943_s20 + $0x10c] sm:$0xf0]  ;;  %v2573_v46 = vor.u32 %v3163_v33, %v2572_v32  ;;  %1879 = vmatpush.bf16.msra.mxu2 %v2845_v35  ;;  %v3213_v8 = vld [vmem:[%s3943_s20 + $0x1a4] sm:$0xf]  ;;  %v2657_v17 = vor.u32 %v3181_v4, %v2654_v7 }
 0x1a9   : > { %v2828_v38 = vld [vmem:[%s3943_s20 + $0x200] sm:$0xf]  ;;  %v3227_v40 = vld [vmem:[%s3943_s20 + $0x20c] sm:$0xf0]  ;;  %v2701_v50 = vor.u32 %v3195_v37, %v2700_v36  ;;  %1893 = vmatpush.bf16.msra.mxu3 %v2973_v39  ;;  %v2782_v9 = vld [vmem:[%s3943_s20 + $0x1b0] sm:$0xf0] }
 0x1aa   : > { %v2956_v41 = vld [vmem:[%s3943_s20 + $0x300] sm:$0xf]  ;;  %v3259_v42 = vld [vmem:[%s3943_s20 + $0x30c] sm:$0xf0]  ;;  %v2829_v51 = vor.u32 %v3227_v40, %v2828_v38  ;;  %1852 = vmatpush.bf16.msra.mxu0 %v2573_v46  ;;  %v3245_v11 = vld [vmem:[%s3943_s20 + $0x2a4] sm:$0xf]  ;;  %v2785_v22 = vor.u32 %v3213_v8, %v2782_v9 }
 0x1ab   : > { %v2957_v54 = vor.u32 %v3259_v42, %v2956_v41  ;;  %1866 = vmatpush.bf16.msra.mxu1 %v2701_v50  ;;  %v2910_v12 = vld [vmem:[%s3943_s20 + $0x2b0] sm:$0xf0]  ;;  %v3277_v13 = vld [vmem:[%s3943_s20 + $0x3a4] sm:$0xf]  ;;  %v2564_v20 = vld [vmem:[#allocation2 + $0x8] sm:$0xf] }
 0x1ac   : > { %1880 = vmatpush.bf16.msra.mxu2 %v2829_v51  ;;  %v3038_v14 = vld [vmem:[%s3943_s20 + $0x3b0] sm:$0xf0]  ;;  %v3177_v15 = vld [vmem:[%s3943_s20 + $0x84] sm:$0xf]  ;;  %v3160_v21 = vld [vmem:[#allocation2 + $0x14] sm:$0xf0]  ;;  %v2913_v23 = vor.u32 %v3245_v11, %v2910_v12 }
 0x1ad   : > { %1894 = vmatpush.bf16.msra.mxu3 %v2957_v54  ;;  %v2638_v16 = vld [vmem:[%s3943_s20 + $0x90] sm:$0xf0]  ;;  %v3209_v18 = vld [vmem:[%s3943_s20 + $0x184] sm:$0xf]  ;;  %v4050_v24 = vor.u32 %v3160_v21, %v2564_v20  ;;  %v3158_v27 = vld [vmem:[#allocation2 + $0xc] sm:$0xf]  ;;  %v3041_v28 = vor.u32 %v3277_v13, %v3038_v14 }
 0x1ae   : > { %1901 = vmatpush.bf16.msrb.mxu0 %v2689_v55  ;;  %v2766_v19 = vld [vmem:[%s3943_s20 + $0x190] sm:$0xf0]  ;;  %v3159_v26 = vld [vmem:[#allocation2 + $0xc] sm:$0xf0]  ;;  %v2566_v32 = vld [vmem:[#allocation2 + $0x18] sm:$0xf0]  ;;  %v2641_v36 = vor.u32 %v3177_v15, %v2638_v16 }
 0x1af   : > { %1915 = vmatpush.bf16.msrb.mxu1 %v2817_v56  ;;  %v2556_v25 = vld [vmem:[#allocation2] sm:$0xf]  ;;  %v3241_v29 = vld [vmem:[%s3943_s20 + $0x284] sm:$0xf]  ;;  %1881 = vmatmul.bf16.vlgmr.msra.gmra.mxu2 %v4050_v24  ;;  %v4059_v35 = vor.u32 %v3158_v27, %v2566_v32  ;;  %v2769_v39 = vor.u32 %v3209_v18, %v2766_v19  ;;  %v3157_v42 = vld [vmem:[#allocation2 + $0x4] sm:$0xf] }
 0x1b0   : > { %1929 = vmatpush.bf16.msrb.mxu2 %v2945_v57  ;;  %v2894_v30 = vld [vmem:[%s3943_s20 + $0x290] sm:$0xf0]  ;;  %v4054_v31 = vor.u32 %v3159_v26, %v2556_v25  ;;  %v3273_v33 = vld [vmem:[%s3943_s20 + $0x384] sm:$0xf]  ;;  %v3192_v25 = vld [vmem:[%s3943_s20 + $0xf4] sm:$0xf0] }
 0x1b1   : > { %1943 = vmatpush.bf16.msrb.mxu3 %v3073_v61  ;;  %v3022_v34 = vld [vmem:[%s3943_s20 + $0x390] sm:$0xf0]  ;;  %v3173_v37 = vld [vmem:[%s3943_s20 + $0x64] sm:$0xf]  ;;  %v2897_v40 = vor.u32 %v3241_v29, %v2894_v30  ;;  %v2820_v26 = vld [vmem:[%s3943_s20 + $0x1e8] sm:$0xf] }
 0x1b2   : > { %1902 = vmatpush.bf16.msrb.mxu0 %v2673_v3  ;;  %v2622_v38 = vld [vmem:[%s3943_s20 + $0x70] sm:$0xf0]  ;;  %v3205_v41 = vld [vmem:[%s3943_s20 + $0x164] sm:$0xf]  ;;  %v3025_v44 = vor.u32 %v3273_v33, %v3022_v34  ;;  %1895 = vmatmul.bf16.vlgmr.msra.gmra.mxu3 %v4059_v35  ;;  %v2948_v29 = vld [vmem:[%s3943_s20 + $0x2e8] sm:$0xf] }
 0x1b3   : > { %1916 = vmatpush.bf16.msrb.mxu1 %v2801_v5  ;;  %v2558_v43 = vld [vmem:[#allocation2 + $0x10] sm:$0xf0]  ;;  %v2750_v45 = vld [vmem:[%s3943_s20 + $0x170] sm:$0xf0]  ;;  %1853 = vmatmul.bf16.vlgmr.msra.gmra.mxu0 %v4054_v31  ;;  %v2625_v51 = vor.u32 %v3173_v37, %v2622_v38  ;;  %v3256_v30 = vld [vmem:[%s3943_s20 + $0x2f4] sm:$0xf0] }
 0x1b4   : > { %1930 = vmatpush.bf16.msrb.mxu2 %v2929_v6  ;;  %v3237_v46 = vld [vmem:[%s3943_s20 + $0x264] sm:$0xf]  ;;  %v2878_v47 = vld [vmem:[%s3943_s20 + $0x270] sm:$0xf0]  ;;  %v4068_v48 = vor.u32 %v3157_v42, %v2558_v43  ;;  %v2753_v52 = vor.u32 %v3205_v41, %v2750_v45  ;;  %v3076_v34 = vld [vmem:[%s3943_s20 + $0x3e8] sm:$0xf] }
 0x1b5   : > { %1944 = vmatpush.bf16.msrb.mxu3 %v3057_v10  ;;  %v3269_v49 = vld [vmem:[%s3943_s20 + $0x364] sm:$0xf]  ;;  %v3006_v50 = vld [vmem:[%s3943_s20 + $0x370] sm:$0xf0]  ;;  %v2881_v53 = vor.u32 %v3237_v46, %v2878_v47  ;;  %v2676_v41 = vld [vmem:[%s3943_s20 + $0xc8] sm:$0xf] }
 0x1b6   : > { %1903 = vmatpush.bf16.msrb.mxu0 %v2657_v17  ;;  %1867 = vmatmul.bf16.vlgmr.msra.gmra.mxu1 %v4068_v48  ;;  %v3169_v54 = vld [vmem:[%s3943_s20 + $0x44] sm:$0xf]  ;;  %v2606_v55 = vld [vmem:[%s3943_s20 + $0x50] sm:$0xf0]  ;;  %v3009_v57 = vor.u32 %v3269_v49, %v3006_v50  ;;  %v3188_v42 = vld [vmem:[%s3943_s20 + $0xd4] sm:$0xf0] }
 0x1b7   : > { %1917 = vmatpush.bf16.msrb.mxu1 %v2785_v22  ;;  %v3201_v56 = vld [vmem:[%s3943_s20 + $0x144] sm:$0xf]  ;;  %v2734_v58 = vld [vmem:[%s3943_s20 + $0x150] sm:$0xf0]  ;;  %v2609_v63 = vor.u32 %v3169_v54, %v2606_v55  ;;  %v2804_v43 = vld [vmem:[%s3943_s20 + $0x1c8] sm:$0xf] }
 0x1b8   : > { %1931 = vmatpush.bf16.msrb.mxu2 %v2913_v23  ;;  %v3233_v59 = vld [vmem:[%s3943_s20 + $0x244] sm:$0xf]  ;;  %v2862_v60 = vld [vmem:[%s3943_s20 + $0x250] sm:$0xf0]  ;;  %v2737_v0 = vor.u32 %v3201_v56, %v2734_v58  ;;  %v2692_v23 = vld [vmem:[%s3943_s20 + $0xe8] sm:$0xf] }
 0x1b9   : > { %1945 = vmatpush.bf16.msrb.mxu3 %v3041_v28  ;;  %v3265_v61 = vld [vmem:[%s3943_s20 + $0x344] sm:$0xf]  ;;  %v2990_v62 = vld [vmem:[%s3943_s20 + $0x350] sm:$0xf0]  ;;  %v2865_v1 = vor.u32 %v3233_v59, %v2862_v60  ;;  %v3224_v28 = vld [vmem:[%s3943_s20 + $0x1f4] sm:$0xf0]  ;;  %v2693_v38 = vor.u32 %v3192_v25, %v2692_v23 }
 0x1ba   : > { %1904 = vmatpush.bf16.msrb.mxu0 %v2641_v36  ;;  %v3165_v2 = vld [vmem:[%s3943_s20 + $0x24] sm:$0xf]  ;;  %v2590_v3 = vld [vmem:[%s3943_s20 + $0x30] sm:$0xf0]  ;;  %v2993_v5 = vor.u32 %v3265_v61, %v2990_v62  ;;  %v3288_v36 = vld [vmem:[%s3943_s20 + $0x3f4] sm:$0xf0] }
 0x1bb   : > { %1918 = vmatpush.bf16.msrb.mxu1 %v2769_v39  ;;  %v3197_v4 = vld [vmem:[%s3943_s20 + $0x124] sm:$0xf]  ;;  %v2718_v6 = vld [vmem:[%s3943_s20 + $0x130] sm:$0xf0]  ;;  %v2593_v11 = vor.u32 %v3165_v2, %v2590_v3  ;;  %v2821_v39 = vor.u32 %v3224_v28, %v2820_v26  ;;  %v3220_v45 = vld [vmem:[%s3943_s20 + $0x1d4] sm:$0xf0] }
 0x1bc   : > { %1932 = vmatpush.bf16.msrb.mxu2 %v2897_v40  ;;  %v3229_v7 = vld [vmem:[%s3943_s20 + $0x224] sm:$0xf]  ;;  %v2846_v8 = vld [vmem:[%s3943_s20 + $0x230] sm:$0xf0]  ;;  %v2721_v14 = vor.u32 %v3197_v4, %v2718_v6  ;;  %v2949_v40 = vor.u32 %v3256_v30, %v2948_v29  ;;  %v2932_v46 = vld [vmem:[%s3943_s20 + $0x2c8] sm:$0xf] }
 0x1bd   : > { %1946 = vmatpush.bf16.msrb.mxu3 %v3025_v44  ;;  %v3261_v9 = vld [vmem:[%s3943_s20 + $0x324] sm:$0xf]  ;;  %v2974_v10 = vld [vmem:[%s3943_s20 + $0x330] sm:$0xf0]  ;;  %v2849_v15 = vor.u32 %v3229_v7, %v2846_v8  ;;  %v3077_v44 = vor.u32 %v3288_v36, %v3076_v34  ;;  %v3252_v47 = vld [vmem:[%s3943_s20 + $0x2d4] sm:$0xf0] }
 0x1be   : > { %1905 = vmatpush.bf16.msrb.mxu0 %v2625_v51  ;;  %v3161_v12 = vld [vmem:[%s3943_s20 + $0x4] sm:$0xf]  ;;  %v2574_v13 = vld [vmem:[%s3943_s20 + $0x10] sm:$0xf0]  ;;  %v2977_v19 = vor.u32 %v3261_v9, %v2974_v10  ;;  %v3060_v49 = vld [vmem:[%s3943_s20 + $0x3c8] sm:$0xf]  ;;  %v2677_v51 = vor.u32 %v3188_v42, %v2676_v41 }
 0x1bf   : > { %1919 = vmatpush.bf16.msrb.mxu1 %v2753_v52  ;;  %v3193_v16 = vld [vmem:[%s3943_s20 + $0x104] sm:$0xf]  ;;  %v2702_v17 = vld [vmem:[%s3943_s20 + $0x110] sm:$0xf0]  ;;  %v2577_v27 = vor.u32 %v3161_v12, %v2574_v13  ;;  %v3284_v50 = vld [vmem:[%s3943_s20 + $0x3d4] sm:$0xf0]  ;;  %v2805_v52 = vor.u32 %v3220_v45, %v2804_v43 }
 0x1c0   : > { %1933 = vmatpush.bf16.msrb.mxu2 %v2881_v53  ;;  %v3225_v18 = vld [vmem:[%s3943_s20 + $0x204] sm:$0xf]  ;;  %v2830_v20 = vld [vmem:[%s3943_s20 + $0x210] sm:$0xf0]  ;;  %v2705_v32 = vor.u32 %v3193_v16, %v2702_v17  ;;  %v2933_v53 = vor.u32 %v3252_v47, %v2932_v46  ;;  %v2660_v54 = vld [vmem:[%s3943_s20 + $0xa8] sm:$0xf] }
 0x1c1   : > { %1947 = vmatpush.bf16.msrb.mxu3 %v3009_v57  ;;  %v3257_v21 = vld [vmem:[%s3943_s20 + $0x304] sm:$0xf]  ;;  %v2958_v22 = vld [vmem:[%s3943_s20 + $0x310] sm:$0xf0]  ;;  %v2833_v33 = vor.u32 %v3225_v18, %v2830_v20  ;;  %v3184_v55 = vld [vmem:[%s3943_s20 + $0xb4] sm:$0xf0]  ;;  %v3061_v57 = vor.u32 %v3284_v50, %v3060_v49 }
 0x1c2   : > { %1906 = vmatpush.bf16.msrb.mxu0 %v2609_v63  ;;  %v2961_v37 = vor.u32 %v3257_v21, %v2958_v22  ;;  %v2788_v56 = vld [vmem:[%s3943_s20 + $0x1a8] sm:$0xf]  ;;  %v3216_v58 = vld [vmem:[%s3943_s20 + $0x1b4] sm:$0xf0]  ;;  %v2661_v63 = vor.u32 %v3184_v55, %v2660_v54 }
 0x1c3   : > { %1920 = vmatpush.bf16.msrb.mxu1 %v2737_v0  ;;  %v2916_v59 = vld [vmem:[%s3943_s20 + $0x2a8] sm:$0xf]  ;;  %v3248_v60 = vld [vmem:[%s3943_s20 + $0x2b4] sm:$0xf0]  ;;  %v2789_v0 = vor.u32 %v3216_v58, %v2788_v56 }
 0x1c4   : > { %1934 = vmatpush.bf16.msrb.mxu2 %v2865_v1  ;;  %v3044_v61 = vld [vmem:[%s3943_s20 + $0x3a8] sm:$0xf]  ;;  %v3280_v62 = vld [vmem:[%s3943_s20 + $0x3b4] sm:$0xf0]  ;;  %v2917_v1 = vor.u32 %v3248_v60, %v2916_v59 }
 0x1c5   : > { %1948 = vmatpush.bf16.msrb.mxu3 %v2993_v5  ;;  %v2644_v2 = vld [vmem:[%s3943_s20 + $0x88] sm:$0xf]  ;;  %v3180_v3 = vld [vmem:[%s3943_s20 + $0x94] sm:$0xf0]  ;;  %v3045_v5 = vor.u32 %v3280_v62, %v3044_v61 }
 0x1c6   : > { %1907 = vmatpush.bf16.msrb.mxu0 %v2593_v11  ;;  %v2772_v4 = vld [vmem:[%s3943_s20 + $0x188] sm:$0xf]  ;;  %v3212_v6 = vld [vmem:[%s3943_s20 + $0x194] sm:$0xf0]  ;;  %v2645_v11 = vor.u32 %v3180_v3, %v2644_v2  ;;  %v2822_v3 = vld [vmem:[%s3943_s20 + $0x1f8] sm:$0xf0] }
 0x1c7   : > { %1921 = vmatpush.bf16.msrb.mxu1 %v2721_v14  ;;  %v2900_v7 = vld [vmem:[%s3943_s20 + $0x288] sm:$0xf]  ;;  %v3244_v8 = vld [vmem:[%s3943_s20 + $0x294] sm:$0xf0]  ;;  %v2773_v12 = vor.u32 %v3212_v6, %v2772_v4  ;;  %v3254_v4 = vld [vmem:[%s3943_s20 + $0x2ec] sm:$0xf] }
 0x1c8   : > { %1935 = vmatpush.bf16.msrb.mxu2 %v2849_v15  ;;  %v3028_v9 = vld [vmem:[%s3943_s20 + $0x388] sm:$0xf]  ;;  %v3276_v10 = vld [vmem:[%s3943_s20 + $0x394] sm:$0xf0]  ;;  %v2901_v13 = vor.u32 %v3244_v8, %v2900_v7  ;;  %v3286_v8 = vld [vmem:[%s3943_s20 + $0x3ec] sm:$0xf] }
 0x1c9   : > { %1949 = vmatpush.bf16.msrb.mxu3 %v2977_v19  ;;  %v2628_v14 = vld [vmem:[%s3943_s20 + $0x68] sm:$0xf]  ;;  %v3176_v15 = vld [vmem:[%s3943_s20 + $0x74] sm:$0xf0]  ;;  %v3029_v17 = vor.u32 %v3276_v10, %v3028_v9  ;;  %v3078_v9 = vld [vmem:[%s3943_s20 + $0x3f8] sm:$0xf0] }
 0x1ca   : > { %1908 = vmatpush.bf16.msrb.mxu0 %v2577_v27  ;;  %v2756_v16 = vld [vmem:[%s3943_s20 + $0x168] sm:$0xf]  ;;  %v3208_v18 = vld [vmem:[%s3943_s20 + $0x174] sm:$0xf0]  ;;  %v2629_v23 = vor.u32 %v3176_v15, %v2628_v14  ;;  %v3186_v14 = vld [vmem:[%s3943_s20 + $0xcc] sm:$0xf] }
 0x1cb   : > { %1922 = vmatpush.bf16.msrb.mxu1 %v2705_v32  ;;  %v2884_v19 = vld [vmem:[%s3943_s20 + $0x268] sm:$0xf]  ;;  %v3240_v20 = vld [vmem:[%s3943_s20 + $0x274] sm:$0xf0]  ;;  %v2757_v25 = vor.u32 %v3208_v18, %v2756_v16  ;;  %v2678_v15 = vld [vmem:[%s3943_s20 + $0xd8] sm:$0xf0] }
 0x1cc   : > { %1936 = vmatpush.bf16.msrb.mxu2 %v2833_v33  ;;  %v3012_v21 = vld [vmem:[%s3943_s20 + $0x368] sm:$0xf]  ;;  %v3272_v22 = vld [vmem:[%s3943_s20 + $0x374] sm:$0xf0]  ;;  %v2885_v26 = vor.u32 %v3240_v20, %v2884_v19  ;;  %v3218_v16 = vld [vmem:[%s3943_s20 + $0x1cc] sm:$0xf] }
 0x1cd   : > { %1950 = vmatpush.bf16.msrb.mxu3 %v2961_v37  ;;  %1909 = vmatmul.bf16.vlgmr.msrb.gmra.mxu0 %v4054_v31  ;;  %v2612_v27 = vld [vmem:[%s3943_s20 + $0x48] sm:$0xf]  ;;  %v3172_v28 = vld [vmem:[%s3943_s20 + $0x54] sm:$0xf0]  ;;  %v3013_v30 = vor.u32 %v3272_v22, %v3012_v21  ;;  %v2806_v18 = vld [vmem:[%s3943_s20 + $0x1d8] sm:$0xf0] }
 0x1ce   : > { %1957 = vmatpush.bf16.msra.mxu0 %v2693_v38  ;;  %1923 = vmatmul.bf16.vlgmr.msrb.gmra.mxu1 %v4068_v48  ;;  %v2740_v29 = vld [vmem:[%s3943_s20 + $0x148] sm:$0xf]  ;;  %v3204_v32 = vld [vmem:[%s3943_s20 + $0x154] sm:$0xf0]  ;;  %v2613_v38 = vor.u32 %v3172_v28, %v2612_v27  ;;  %v3250_v19 = vld [vmem:[%s3943_s20 + $0x2cc] sm:$0xf] }
 0x1cf   : > { %1971 = vmatpush.bf16.msra.mxu1 %v2821_v39  ;;  %1937 = vmatmul.bf16.vlgmr.msrb.gmra.mxu2 %v4050_v24  ;;  %v2868_v33 = vld [vmem:[%s3943_s20 + $0x248] sm:$0xf]  ;;  %v3236_v34 = vld [vmem:[%s3943_s20 + $0x254] sm:$0xf0]  ;;  %v2741_v39 = vor.u32 %v3204_v32, %v2740_v29  ;;  %v2934_v20 = vld [vmem:[%s3943_s20 + $0x2d8] sm:$0xf0] }
 0x1d0   : > { %1985 = vmatpush.bf16.msra.mxu2 %v2949_v40  ;;  %1951 = vmatmul.bf16.vlgmr.msrb.gmra.mxu3 %v4059_v35  ;;  %v2996_v36 = vld [vmem:[%s3943_s20 + $0x348] sm:$0xf]  ;;  %v3268_v37 = vld [vmem:[%s3943_s20 + $0x354] sm:$0xf0]  ;;  %v2869_v40 = vor.u32 %v3236_v34, %v2868_v33  ;;  %v3282_v21 = vld [vmem:[%s3943_s20 + $0x3cc] sm:$0xf] }
 0x1d1   : > { %1999 = vmatpush.bf16.msra.mxu3 %v3077_v44  ;;  %v2596_v41 = vld [vmem:[%s3943_s20 + $0x28] sm:$0xf]  ;;  %v3168_v42 = vld [vmem:[%s3943_s20 + $0x34] sm:$0xf0]  ;;  %v2997_v44 = vor.u32 %v3268_v37, %v2996_v36  ;;  %v3062_v22 = vld [vmem:[%s3943_s20 + $0x3d8] sm:$0xf0] }
 0x1d2   : > { %1958 = vmatpush.bf16.msra.mxu0 %v2677_v51  ;;  %v2724_v43 = vld [vmem:[%s3943_s20 + $0x128] sm:$0xf]  ;;  %v3200_v45 = vld [vmem:[%s3943_s20 + $0x134] sm:$0xf0]  ;;  %v2597_v51 = vor.u32 %v3168_v42, %v2596_v41  ;;  %v3182_v27 = vld [vmem:[%s3943_s20 + $0xac] sm:$0xf] }
 0x1d3   : > { %1972 = vmatpush.bf16.msra.mxu1 %v2805_v52  ;;  %v2852_v46 = vld [vmem:[%s3943_s20 + $0x228] sm:$0xf]  ;;  %v3232_v47 = vld [vmem:[%s3943_s20 + $0x234] sm:$0xf0]  ;;  %v2725_v54 = vor.u32 %v3200_v45, %v2724_v43  ;;  %v2662_v28 = vld [vmem:[%s3943_s20 + $0xb8] sm:$0xf0] }
 0x1d4   : > { %1986 = vmatpush.bf16.msra.mxu2 %v2933_v53  ;;  %v2980_v49 = vld [vmem:[%s3943_s20 + $0x328] sm:$0xf]  ;;  %v3264_v50 = vld [vmem:[%s3943_s20 + $0x334] sm:$0xf0]  ;;  %v2853_v55 = vor.u32 %v3232_v47, %v2852_v46  ;;  %v3214_v29 = vld [vmem:[%s3943_s20 + $0x1ac] sm:$0xf] }
 0x1d5   : > { %2000 = vmatpush.bf16.msra.mxu3 %v3061_v57  ;;  %v2580_v52 = vld [vmem:[%s3943_s20 + $0x8] sm:$0xf]  ;;  %v3164_v53 = vld [vmem:[%s3943_s20 + $0x14] sm:$0xf0]  ;;  %v2981_v59 = vor.u32 %v3264_v50, %v2980_v49  ;;  %v2790_v32 = vld [vmem:[%s3943_s20 + $0x1b8] sm:$0xf0] }
 0x1d6   : > { %1959 = vmatpush.bf16.msra.mxu0 %v2661_v63  ;;  %v2708_v56 = vld [vmem:[%s3943_s20 + $0x108] sm:$0xf]  ;;  %v3196_v57 = vld [vmem:[%s3943_s20 + $0x114] sm:$0xf0]  ;;  %v3190_v63 = vld [vmem:[%s3943_s20 + $0xec] sm:$0xf]  ;;  %v2581_v2 = vor.u32 %v3164_v53, %v2580_v52 }
 0x1d7   : > { %1973 = vmatpush.bf16.msra.mxu1 %v2789_v0  ;;  %v2836_v58 = vld [vmem:[%s3943_s20 + $0x208] sm:$0xf]  ;;  %v3228_v60 = vld [vmem:[%s3943_s20 + $0x214] sm:$0xf0]  ;;  %v2694_v0 = vld [vmem:[%s3943_s20 + $0xf8] sm:$0xf0]  ;;  %v2709_v6 = vor.u32 %v3196_v57, %v2708_v56 }
 0x1d8   : > { %1987 = vmatpush.bf16.msra.mxu2 %v2917_v1  ;;  %v2964_v61 = vld [vmem:[%s3943_s20 + $0x308] sm:$0xf]  ;;  %v3260_v62 = vld [vmem:[%s3943_s20 + $0x314] sm:$0xf0]  ;;  %v3222_v1 = vld [vmem:[%s3943_s20 + $0x1ec] sm:$0xf]  ;;  %v2837_v7 = vor.u32 %v3228_v60, %v2836_v58 }
 0x1d9   : > { %2001 = vmatpush.bf16.msra.mxu3 %v3045_v5  ;;  %v2950_v5 = vld [vmem:[%s3943_s20 + $0x2f8] sm:$0xf0]  ;;  %v2965_v10 = vor.u32 %v3260_v62, %v2964_v61  ;;  %v3246_v33 = vld [vmem:[%s3943_s20 + $0x2ac] sm:$0xf] }
 0x1da   : > { %1960 = vmatpush.bf16.msra.mxu0 %v2645_v11  ;;  %v2697_v11 = vor.u32 %v3190_v63, %v2694_v0  ;;  %v2918_v34 = vld [vmem:[%s3943_s20 + $0x2b8] sm:$0xf0]  ;;  %v3278_v36 = vld [vmem:[%s3943_s20 + $0x3ac] sm:$0xf] }
 0x1db   : > { %1974 = vmatpush.bf16.msra.mxu1 %v2773_v12  ;;  %v2825_v12 = vor.u32 %v3222_v1, %v2822_v3  ;;  %v3046_v37 = vld [vmem:[%s3943_s20 + $0x3b8] sm:$0xf0]  ;;  %v3178_v41 = vld [vmem:[%s3943_s20 + $0x8c] sm:$0xf] }
 0x1dc   : > { %1988 = vmatpush.bf16.msra.mxu2 %v2901_v13  ;;  %v2953_v13 = vor.u32 %v3254_v4, %v2950_v5  ;;  %v2646_v42 = vld [vmem:[%s3943_s20 + $0x98] sm:$0xf0]  ;;  %v3210_v43 = vld [vmem:[%s3943_s20 + $0x18c] sm:$0xf] }
 0x1dd   : > { %2002 = vmatpush.bf16.msra.mxu3 %v3029_v17  ;;  %v3081_v17 = vor.u32 %v3286_v8, %v3078_v9  ;;  %v2774_v45 = vld [vmem:[%s3943_s20 + $0x198] sm:$0xf0]  ;;  %v3242_v46 = vld [vmem:[%s3943_s20 + $0x28c] sm:$0xf] }
 0x1de   : > { %1961 = vmatpush.bf16.msra.mxu0 %v2629_v23  ;;  %v2681_v23 = vor.u32 %v3186_v14, %v2678_v15  ;;  %v2902_v47 = vld [vmem:[%s3943_s20 + $0x298] sm:$0xf0]  ;;  %v3274_v49 = vld [vmem:[%s3943_s20 + $0x38c] sm:$0xf]  ;;  %v2777_v52 = vor.u32 %v3210_v43, %v2774_v45 }
 0x1df   : > { %1975 = vmatpush.bf16.msra.mxu1 %v2757_v25  ;;  %v2809_v25 = vor.u32 %v3218_v16, %v2806_v18  ;;  %v3030_v50 = vld [vmem:[%s3943_s20 + $0x398] sm:$0xf0]  ;;  %v2905_v53 = vor.u32 %v3242_v46, %v2902_v47  ;;  %v3206_v56 = vld [vmem:[%s3943_s20 + $0x16c] sm:$0xf] }
 0x1e0   : > { %1989 = vmatpush.bf16.msra.mxu2 %v2885_v26  ;;  %v2937_v26 = vor.u32 %v3250_v19, %v2934_v20  ;;  %v3033_v57 = vor.u32 %v3274_v49, %v3030_v50  ;;  %v2758_v58 = vld [vmem:[%s3943_s20 + $0x178] sm:$0xf0]  ;;  %v3270_v61 = vld [vmem:[%s3943_s20 + $0x36c] sm:$0xf] }
 0x1e1   : > { %2003 = vmatpush.bf16.msra.mxu3 %v3013_v30  ;;  %v3065_v30 = vor.u32 %v3282_v21, %v3062_v22  ;;  %v2886_v60 = vld [vmem:[%s3943_s20 + $0x278] sm:$0xf0]  ;;  %v2761_v0 = vor.u32 %v3206_v56, %v2758_v58  ;;  %v3202_v4 = vld [vmem:[%s3943_s20 + $0x14c] sm:$0xf] }
 0x1e2   : > { %1962 = vmatpush.bf16.msra.mxu0 %v2613_v38  ;;  %v2665_v38 = vor.u32 %v3182_v27, %v2662_v28  ;;  %v3014_v62 = vld [vmem:[%s3943_s20 + $0x378] sm:$0xf0]  ;;  %v3266_v9 = vld [vmem:[%s3943_s20 + $0x34c] sm:$0xf] }
 0x1e3   : > { %1976 = vmatpush.bf16.msra.mxu1 %v2741_v39  ;;  %v2793_v39 = vor.u32 %v3214_v29, %v2790_v32  ;;  %v2614_v3 = vld [vmem:[%s3943_s20 + $0x58] sm:$0xf0]  ;;  %v3017_v5 = vor.u32 %v3270_v61, %v3014_v62  ;;  %v3166_v14 = vld [vmem:[%s3943_s20 + $0x2c] sm:$0xf] }
 0x1e4   : > { %1990 = vmatpush.bf16.msra.mxu2 %v2869_v40  ;;  %v2921_v40 = vor.u32 %v3246_v33, %v2918_v34  ;;  %v2870_v8 = vld [vmem:[%s3943_s20 + $0x258] sm:$0xf0]  ;;  %v3198_v16 = vld [vmem:[%s3943_s20 + $0x12c] sm:$0xf] }
 0x1e5   : > { %2004 = vmatpush.bf16.msra.mxu3 %v2997_v44  ;;  %v3049_v44 = vor.u32 %v3278_v36, %v3046_v37  ;;  %v2598_v15 = vld [vmem:[%s3943_s20 + $0x38] sm:$0xf0]  ;;  %v3230_v19 = vld [vmem:[%s3943_s20 + $0x22c] sm:$0xf] }
 0x1e6   : > { %1963 = vmatpush.bf16.msra.mxu0 %v2597_v51  ;;  %v2649_v51 = vor.u32 %v3178_v41, %v2646_v42  ;;  %v2726_v18 = vld [vmem:[%s3943_s20 + $0x138] sm:$0xf0]  ;;  %v3262_v21 = vld [vmem:[%s3943_s20 + $0x32c] sm:$0xf]  ;;  %v4239_v42 = vld [vmem:[%s3951_s12] sm:$0xf] }
 0x1e7   : > { %1977 = vmatpush.bf16.msra.mxu1 %v2725_v54  ;;  %v3174_v54 = vld [vmem:[%s3943_s20 + $0x6c] sm:$0xf]  ;;  %v2854_v20 = vld [vmem:[%s3943_s20 + $0x238] sm:$0xf0]  ;;  %v1177_v43 = vperm.slane %v4239_v42, 0 }
 0x1e8   : > { %1991 = vmatpush.bf16.msra.mxu2 %v2853_v55  ;;  %v2630_v55 = vld [vmem:[%s3943_s20 + $0x78] sm:$0xf0]  ;;  %v3162_v27 = vld [vmem:[%s3943_s20 + $0xc] sm:$0xf] }
 0x1e9   : > { %2005 = vmatpush.bf16.msra.mxu3 %v2981_v59  ;;  %v3238_v59 = vld [vmem:[%s3943_s20 + $0x26c] sm:$0xf]  ;;  %v2633_v63 = vor.u32 %v3174_v54, %v2630_v55  ;;  %v2982_v22 = vld [vmem:[%s3943_s20 + $0x338] sm:$0xf0] }
 0x1ea   : > { %1964 = vmatpush.bf16.msra.mxu0 %v2581_v2  ;;  %v2889_v1 = vor.u32 %v3238_v59, %v2886_v60  ;;  %v3170_v2 = vld [vmem:[%s3943_s20 + $0x4c] sm:$0xf]  ;;  %v2582_v28 = vld [vmem:[%s3943_s20 + $0x18] sm:$0xf0] }
 0x1eb   : > { %1978 = vmatpush.bf16.msra.mxu1 %v2709_v6  ;;  %v2742_v6 = vld [vmem:[%s3943_s20 + $0x158] sm:$0xf0]  ;;  %v3194_v29 = vld [vmem:[%s3943_s20 + $0x10c] sm:$0xf] }
 0x1ec   : > { %1992 = vmatpush.bf16.msra.mxu2 %v2837_v7  ;;  %v3234_v7 = vld [vmem:[%s3943_s20 + $0x24c] sm:$0xf]  ;;  %v2710_v32 = vld [vmem:[%s3943_s20 + $0x118] sm:$0xf0] }
 0x1ed   : > { %2006 = vmatpush.bf16.msra.mxu3 %v2965_v10  ;;  %1965 = vmatmul.bf16.vlgmr.msra.gmra.mxu0 %v4054_v31  ;;  %v2998_v10 = vld [vmem:[%s3943_s20 + $0x358] sm:$0xf0]  ;;  %v3226_v33 = vld [vmem:[%s3943_s20 + $0x20c] sm:$0xf] }
 0x1ee   : > { %2013 = vmatpush.bf16.msrb.mxu0 %v2697_v11  ;;  %1979 = vmatmul.bf16.vlgmr.msra.gmra.mxu1 %v4068_v48  ;;  %v2617_v11 = vor.u32 %v3170_v2, %v2614_v3  ;;  %v2838_v34 = vld [vmem:[%s3943_s20 + $0x218] sm:$0xf0]  ;;  %v3258_v36 = vld [vmem:[%s3943_s20 + $0x30c] sm:$0xf] }
 0x1ef   : > { %2027 = vmatpush.bf16.msrb.mxu1 %v2825_v12  ;;  %1993 = vmatmul.bf16.vlgmr.msra.gmra.mxu2 %v4050_v24  ;;  %v2745_v12 = vor.u32 %v3202_v4, %v2742_v6  ;;  %v2966_v37 = vld [vmem:[%s3943_s20 + $0x318] sm:$0xf0] }
 0x1f0   : > { %2041 = vmatpush.bf16.msrb.mxu2 %v2953_v13  ;;  %2007 = vmatmul.bf16.vlgmr.msra.gmra.mxu3 %v4059_v35  ;;  %v2873_v13 = vor.u32 %v3234_v7, %v2870_v8  ;;  %v2969_v41 = vor.u32 %v3258_v36, %v2966_v37 }
 0x1f1   : > { %2055 = vmatpush.bf16.msrb.mxu3 %v3081_v17  ;;  %v3001_v17 = vor.u32 %v3266_v9, %v2998_v10  ;;  %v1179_v10 = vperm.slane %v4239_v42, 2 }
 0x1f2   : > { %2014 = vmatpush.bf16.msrb.mxu0 %v2681_v23  ;;  %v2601_v23 = vor.u32 %v3166_v14, %v2598_v15 }
 0x1f3   : > { %2028 = vmatpush.bf16.msrb.mxu1 %v2809_v25  ;;  %v2729_v25 = vor.u32 %v3198_v16, %v2726_v18 }
 0x1f4   : > { %2042 = vmatpush.bf16.msrb.mxu2 %v2937_v26  ;;  %v2857_v26 = vor.u32 %v3230_v19, %v2854_v20 }
 0x1f5   : > { %2056 = vmatpush.bf16.msrb.mxu3 %v3065_v30  ;;  %v2985_v30 = vor.u32 %v3262_v21, %v2982_v22 }
 0x1f6   : > { %2015 = vmatpush.bf16.msrb.mxu0 %v2665_v38  ;;  %v2585_v38 = vor.u32 %v3162_v27, %v2582_v28  ;;  %v1180_v28 = vperm.slane %v4239_v42, 3 }
 0x1f7   : > { %2029 = vmatpush.bf16.msrb.mxu1 %v2793_v39  ;;  %v2713_v39 = vor.u32 %v3194_v29, %v2710_v32 }
 0x1f8   : > { %2043 = vmatpush.bf16.msrb.mxu2 %v2921_v40  ;;  %v2841_v40 = vor.u32 %v3226_v33, %v2838_v34 }
 0x1f9   : > { %2057 = vmatpush.bf16.msrb.mxu3 %v3049_v44 }
 0x1fa   : > { %2016 = vmatpush.bf16.msrb.mxu0 %v2649_v51 }
 0x1fb   : > { %2030 = vmatpush.bf16.msrb.mxu1 %v2777_v52 }
 0x1fc   : > { %2044 = vmatpush.bf16.msrb.mxu2 %v2905_v53 }
 0x1fd   : > { %2058 = vmatpush.bf16.msrb.mxu3 %v3033_v57  ;;  %v1178_v57 = vperm.slane %v4239_v42, 1 }
 0x1fe   : > { %2017 = vmatpush.bf16.msrb.mxu0 %v2633_v63 }
 0x1ff   : > { %2031 = vmatpush.bf16.msrb.mxu1 %v2761_v0 }
 0x200   : > { %2045 = vmatpush.bf16.msrb.mxu2 %v2889_v1 }
 0x201   : > { %2059 = vmatpush.bf16.msrb.mxu3 %v3017_v5 }
 0x202   : > { %2018 = vmatpush.bf16.msrb.mxu0 %v2617_v11 }
 0x203   : > { %2032 = vmatpush.bf16.msrb.mxu1 %v2745_v12 }
 0x204   : > { %2046 = vmatpush.bf16.msrb.mxu2 %v2873_v13 }
 0x205   : > { %2060 = vmatpush.bf16.msrb.mxu3 %v3001_v17 }
 0x206   : > { %2019 = vmatpush.bf16.msrb.mxu0 %v2601_v23 }
 0x207   : > { %2033 = vmatpush.bf16.msrb.mxu1 %v2729_v25 }
 0x208   : > { %2047 = vmatpush.bf16.msrb.mxu2 %v2857_v26 }
 0x209   : > { %2061 = vmatpush.bf16.msrb.mxu3 %v2985_v30 }
 0x20a   : > { %2020 = vmatpush.bf16.msrb.mxu0 %v2585_v38 }
 0x20b   : > { %2034 = vmatpush.bf16.msrb.mxu1 %v2713_v39 }
 0x20c   : > { %2048 = vmatpush.bf16.msrb.mxu2 %v2841_v40 }
 0x20d   : > { %2062 = vmatpush.bf16.msrb.mxu3 %v2969_v41  ;;  %2021 = vmatmul.bf16.vlgmr.msrb.gmra.mxu0 %v4054_v31 }
 0x20e   : > { %2035 = vmatmul.bf16.vlgmr.msrb.gmra.mxu1 %v4068_v48 }
 0x20f   : > { %2049 = vmatmul.bf16.vlgmr.msrb.gmra.mxu2 %v4050_v24 }
 0x210   : > { %2063 = vmatmul.bf16.vlgmr.msrb.gmra.mxu3 %v4059_v35 }
 0x230   : > { %v1854_v44 = vpop.f32.mrf.mxu0 }
 0x231   : > { %v1855_v45 = vadd.f32 %v1854_v44, %v1177_v43 }
 0x232   : > { %v1882_v49 = vpop.f32.mrf.mxu2 }
 0x233   : > { %v1868_v46 = vpop.f32.mrf.mxu1 }
 0x234   : > { %v1869_v47 = vadd.f32 %v1868_v46, %v1855_v45 }
 0x235   : > { %v1896_v51 = vpop.f32.mrf.mxu3 }
 0x236   : > { %v1883_v50 = vadd.f32 %v1882_v49, %v1869_v47 }
 0x238   : > { %v1897_v31 = vadd.f32 %v1896_v51, %v1883_v50  ;;  %v1856_v52 = vpop.f32.mrf.mxu0 }
 0x239   : > { %v1857_v53 = vadd.f32 %v1856_v52, %v1177_v43 }
 0x23a   : > { %2069 = vst [vmem:[%s3953_s5] sm:$0xff] %v1897_v31  ;;  %v1884_v54 = vpop.f32.mrf.mxu2 }
 0x23b   : > { %v1870_v48 = vpop.f32.mrf.mxu1 }
 0x23c   : > { %v1871_v24 = vadd.f32 %v1870_v48, %v1857_v53 }
 0x23d   : > { %v1898_v55 = vpop.f32.mrf.mxu3 }
 0x23e   : > { %v1885_v35 = vadd.f32 %v1884_v54, %v1871_v24 }
 0x240   : > { %v1899_v56 = vadd.f32 %v1898_v55, %v1885_v35 }
 0x242   : > { %2073 = vst [vmem:[%s3953_s5 + $0x20] sm:$0xff] %v1899_v56 }
 0x24a   : > { %v1910_v58 = vpop.f32.mrf.mxu0 }
 0x24b   : > { %v1911_v59 = vadd.f32 %v1910_v58, %v1178_v57  ;;  %v1924_v60 = vpop.f32.mrf.mxu1 }
 0x24d   : > { %v1925_v61 = vadd.f32 %v1924_v60, %v1911_v59 }
 0x252   : > { %v1938_v62 = vpop.f32.mrf.mxu2  ;;  %v1912_v2 = vpop.f32.mrf.mxu0 }
 0x253   : > { %v1939_v63 = vadd.f32 %v1938_v62, %v1925_v61  ;;  %v1952_v0 = vpop.f32.mrf.mxu3  ;;  %v1913_v3 = vadd.f32 %v1912_v2, %v1178_v57  ;;  %v1926_v4 = vpop.f32.mrf.mxu1 }
 0x255   : > { %v1953_v1 = vadd.f32 %v1952_v0, %v1939_v63  ;;  %v1927_v5 = vadd.f32 %v1926_v4, %v1913_v3 }
 0x257   : > { %2070 = vst [vmem:[%s3953_s5 + $0x8] sm:$0xff] %v1953_v1 }
 0x25a   : > { %v1940_v6 = vpop.f32.mrf.mxu2 }
 0x25b   : > { %v1941_v7 = vadd.f32 %v1940_v6, %v1927_v5  ;;  %v1954_v8 = vpop.f32.mrf.mxu3 }
 0x25d   : > { %v1955_v9 = vadd.f32 %v1954_v8, %v1941_v7 }
 0x25f   : > { %2074 = vst [vmem:[%s3953_s5 + $0x28] sm:$0xff] %v1955_v9 }
 0x26a   : > { %v1966_v11 = vpop.f32.mrf.mxu0 }
 0x26b   : > { %v1967_v12 = vadd.f32 %v1966_v11, %v1179_v10  ;;  %v1980_v13 = vpop.f32.mrf.mxu1 }
 0x26d   : > { %v1981_v14 = vadd.f32 %v1980_v13, %v1967_v12 }
 0x272   : > { %v1994_v15 = vpop.f32.mrf.mxu2  ;;  %v1968_v19 = vpop.f32.mrf.mxu0 }
 0x273   : > { %v1995_v16 = vadd.f32 %v1994_v15, %v1981_v14  ;;  %v2008_v17 = vpop.f32.mrf.mxu3  ;;  %v1969_v20 = vadd.f32 %v1968_v19, %v1179_v10  ;;  %v1982_v21 = vpop.f32.mrf.mxu1 }
 0x275   : > { %v2009_v18 = vadd.f32 %v2008_v17, %v1995_v16  ;;  %v1983_v22 = vadd.f32 %v1982_v21, %v1969_v20 }
 0x277   : > { %2071 = vst [vmem:[%s3953_s5 + $0x10] sm:$0xff] %v2009_v18 }
 0x27a   : > { %v1996_v23 = vpop.f32.mrf.mxu2 }
 0x27b   : > { %v1997_v25 = vadd.f32 %v1996_v23, %v1983_v22  ;;  %v2010_v26 = vpop.f32.mrf.mxu3 }
 0x27d   : > { %v2011_v27 = vadd.f32 %v2010_v26, %v1997_v25 }
 0x27f   : > { %2075 = vst [vmem:[%s3953_s5 + $0x30] sm:$0xff] %v2011_v27 }
 0x28a   : > { %v2022_v29 = vpop.f32.mrf.mxu0 }
 0x28b   : > { %v2023_v30 = vadd.f32 %v2022_v29, %v1180_v28  ;;  %v2036_v32 = vpop.f32.mrf.mxu1 }
 0x28d   : > { %v2037_v33 = vadd.f32 %v2036_v32, %v2023_v30 }
 0x292   : > { %v2050_v34 = vpop.f32.mrf.mxu2  ;;  %v2024_v38 = vpop.f32.mrf.mxu0 }
 0x293   : > { %v2051_v36 = vadd.f32 %v2050_v34, %v2037_v33  ;;  %v2064_v37 = vpop.f32.mrf.mxu3  ;;  %v2025_v40 = vadd.f32 %v2024_v38, %v1180_v28  ;;  %v2038_v41 = vpop.f32.mrf.mxu1 }
 0x295   : > { %v2065_v39 = vadd.f32 %v2064_v37, %v2051_v36  ;;  %v2039_v42 = vadd.f32 %v2038_v41, %v2025_v40 }
 0x297   : > { %2072 = vst [vmem:[%s3953_s5 + $0x18] sm:$0xff] %v2065_v39 }
 0x29a   : > { %v2052_v43 = vpop.f32.mrf.mxu2 }
 0x29b   : > { %v2053_v44 = vadd.f32 %v2052_v43, %v2039_v42  ;;  %v2066_v45 = vpop.f32.mrf.mxu3 }
 0x29d   : > { %v2067_v46 = vadd.f32 %v2066_v45, %v2053_v44 }
 0x29f   : > { %2076 = vst [vmem:[%s3953_s5 + $0x38] sm:$0xff] %v2067_v46 }
 0x2a0   : > { %3655 = shalt.err (!%p3652_p13)
}
 0x2a1   : > { %s3736_s17 = smov 512   ;;  %s3737_s19 = smov 2560  }
 0x2a2   : > { %s3738_s18 = smov 32  }
 0x2a3   : > { %3314 = dma.vmem_to_hbm [thread:$0]  (%p3868_p5), %s2094_s22, 1024, %s2096_s13, %s2078_s27, %s3736_s17, %s3737_s19, %s3738_s18  }
 0x2a4 PF: > { %s4328_s20 = sld [smem:[#allocation22_spill]] }
 0x2a5   : > { %s4329_s24 = sld [smem:[#allocation21_spill]] }
 0x2aa   : > { %p3354_p0 = scmp.ge.s32.totalorder %s4328_s20, 2 }
 0x2ab   : > { %s2110_s12 = sand.u32 1, %s4329_s24  }
 0x2ac   : > { %p3340_p3 = pnand %p3354_p0, %p3824_p6  ;;  %s2111_s5 = scalar_lea.sflag [#allocation5], %s2110_s12 }
 0x2ae   : > { %p3341_p7 = pneg %p3340_p3 }
 0x2b0   : > { %3697 = dma.done.wait (%p3341_p7), %s2111_s5, 1024  }
 0x2b1   : > { %3699 = vsyncadd (%p3341_p7), %s2111_s5, 4294966272  ;;  %s26_s29 = sadd.s32 1, %s4328_s20   ;;  %s4331_s30 = sld [smem:[#allocation25_spill]] }
 0x2b2   : > { %p23_p2 = scmp.ge.s32.totalorder %s26_s29, 7   ;;  %s4332_s16 = sld [smem:[#allocation24_spill]] }
 0x2b3   : > { %s4333_s24 = smov %s3706_s25  ;;  %s4334_s25 = smov %s3710_s26 }
 0x2b4   : > { %s4336_s27 = smov %s3718_s28  ;;  %25 = sbr.rel (!%p23_p2) target bundleno = 13 (0xd), region = 130 }
 0x2b7   : > { %s4335_s26 = smov %s4331_s30 }
 0x2b8   : > { %s4337_s28 = smov %s4332_s16 }
 0x2b9   :  { %2117 = vsyncpa [#allocation4], 1 }
 0x2ba   :  { %2119 = vsyncpa [#allocation4 + $0x1], 1 }
 0x2bb   :  { %2120 = vsyncpa [#allocation7], 1 }
 0x2bc   :  { %2121 = vsyncpa [#allocation10], 1 }
 0x2bd   :  { %2122 = vsyncpa [#allocation13], 1 }
 0x2be   :  { %2124 = vsyncpa [#allocation13 + $0x1], 1 }
 0x2bf   :  { %2125 = vsyncpa [#allocation5], 1 }
 0x2c0   :  { %2127 = vsyncpa [#allocation5 + $0x1], 1 }

</bundles_post_ra>
